<compile_context>
chip_gen: v5e
topology: v5e:2x2
jax: 0.10.0
libtpu: 0.0.40
codegen_flags: <defaults>
</compile_context>

<pallas_src>
import jax
import jax.numpy as jnp
from jax.experimental import pallas as pl
from jax.experimental.pallas import tpu as pltpu


# ------------------------------ Pallas kernel -------------------------------

_SQRT_HALF = 0.7071067811865476


def _erf_f32(x):
    # Abramowitz & Stegun 7.1.26 rational erf approximation (|err| ~ 1.5e-7
    # with an exact reciprocal; the EUP approximate reciprocal keeps the error
    # well under 1e-3, far below bf16 matmul noise).  Only exp/mul/add/select
    # plus pl.reciprocal are used, all of which lower on Mosaic.
    p = 0.3275911
    a1, a2, a3, a4, a5 = (0.254829592, -0.284496736, 1.421413741,
                          -1.453152027, 1.061405429)
    ax = jnp.abs(x)
    t = pl.reciprocal(1.0 + p * ax, approx=True)   # divide -> EUP vrcp
    poly = t * (a1 + t * (a2 + t * (a3 + t * (a4 + t * a5))))
    y = 1.0 - poly * jnp.exp(-ax * ax)             # exp also on the EUP
    return jnp.where(x >= 0.0, y, -y)


def _gelu_exact_f32(x):
    # nn.GELU() default: 0.5 * x * (1 + erf(x / sqrt(2)))
    return 0.5 * x * (1.0 + _erf_f32(x * _SQRT_HALF))


def _mlp_kernel(x_ref, w1_ref, b1_ref, w2_ref, b2_ref, o_ref):
    # x: (tm, K) bf16 | w1: (K, H) bf16 | b1: (1, H) f32
    # w2: (H, O) bf16 | b2: (1, O) f32  | o: (tm, O) f32
    # bf16 operands are fed straight to the MXU (no in-kernel upcast of the
    # full tile); accumulation is f32 via preferred_element_type.
    h = jnp.dot(x_ref[...], w1_ref[...],
                preferred_element_type=jnp.float32) + b1_ref[...]
    h = _gelu_exact_f32(h)                          # GELU math in f32
    # TODO(synk): training-mode dropout (p>0) would need pltpu.prng_seed /
    # prng_random_bits; module default p=0.0 is an exact no-op.
    h = h.astype(w2_ref.dtype)                      # back to bf16 for the MXU
    o = jnp.dot(h, w2_ref[...],
                preferred_element_type=jnp.float32) + b2_ref[...]
    o_ref[...] = o.astype(o_ref.dtype)


# ------------------------------ Module wrapper -------------------------------


class MlpPallas:
    """Pallas TPU port of the PyTorch `Mlp` module (fc1 -> GELU -> fc2).

    Weights are kept in bf16 (single-pass MXU, half the HBM/VMEM footprint);
    biases and all post-matmul math stay in f32.
    """

    def __init__(self, in_features, hidden_features=None, out_features=None,
                 drop=0.0, key=None):
        out_features = out_features or in_features
        hidden_features = hidden_features or in_features
        assert drop == 0.0, "dropout with p>0 not implemented (inference path)"
        self.in_features = in_features
        self.hidden_features = hidden_features
        self.out_features = out_features

        key = jax.random.PRNGKey(0) if key is None else key
        k1, k2, k3, k4 = jax.random.split(key, 4)
        # nn.Linear default init: U(-1/sqrt(fan_in), 1/sqrt(fan_in)),
        # stored pre-transposed as (fan_in, fan_out) so the kernel does x @ W.
        lim1 = 1.0 / (in_features ** 0.5)
        lim2 = 1.0 / (hidden_features ** 0.5)
        self.w1 = jax.random.uniform(
            k1, (in_features, hidden_features), jnp.float32, -lim1, lim1
        ).astype(jnp.bfloat16)
        self.b1 = jax.random.uniform(
            k2, (1, hidden_features), jnp.float32, -lim1, lim1)
        self.w2 = jax.random.uniform(
            k3, (hidden_features, out_features), jnp.float32, -lim2, lim2
        ).astype(jnp.bfloat16)
        self.b2 = jax.random.uniform(
            k4, (1, out_features), jnp.float32, -lim2, lim2)

    # ------------------------------------------------------------------ utils

    @staticmethod
    def _choose_tm(M):
        # Prefer >= 2 grid steps whenever M allows (hides weight DMA / output
        # writeback behind compute and lets v7x shard rows over both TCs).
        # Cap at 256 rows: saturates every generation's MXU and keeps the
        # (tm, H) f32 hidden slab small (v5e: 16 MiB scoped VMEM, 1 store slot).
        for tm in (256, 128, 64, 32, 16):
            if M >= 2 * tm:
                return tm
        return 16   # tiny inputs: one (padded) tile

    def _vmem_limit_bytes(self, tm, single_buffer_weights):
        K, H, O = self.in_features, self.hidden_features, self.out_features
        wbuf = 1 if single_buffer_weights else 2
        weights = wbuf * (2 * K * H + 2 * H * O + 4 * (H + O))   # bf16 W, f32 b
        io_tiles = 2 * (2 * tm * K) + 2 * (4 * tm * O)           # dbl-buffered
        hidden = tm * H * (4 + 2)                                # f32 + bf16
        need = weights + io_tiles + hidden
        return int(min(2 * need + (4 << 20), 64 << 20))

    def _run(self, x2, tm, grid, single_buffer_weights):
        K, H, O = self.in_features, self.hidden_features, self.out_features
        Mp = x2.shape[0]

        if single_buffer_weights:
            # Constant index_map -> never re-fetched; 1 buffer halves resident
            # weight VMEM versus the default double buffering.
            def const_spec(shape):
                return pl.BlockSpec(shape, lambda i: (0, 0),
                                    pipeline_mode=pl.Buffered(1))
        else:
            def const_spec(shape):
                return pl.BlockSpec(shape, lambda i: (0, 0))

        flops = 2 * Mp * (K * H + H * O)
        bytes_accessed = (2 * Mp * K + 2 * (K * H + H * O) + 4 * (H + O)
                          + 4 * Mp * O)

        return pl.pallas_call(
            _mlp_kernel,
            out_shape=jax.ShapeDtypeStruct((Mp, O), jnp.float32),
            grid_spec=pltpu.PrefetchScalarGridSpec(
                num_scalar_prefetch=0,
                grid=grid,
                in_specs=[
                    pl.BlockSpec((tm, K), lambda i: (i, 0)),
                    const_spec((K, H)),     # VMEM-resident weights / biases
                    const_spec((1, H)),
                    const_spec((H, O)),
                    const_spec((1, O)),
                ],
                out_specs=pl.BlockSpec((tm, O), lambda i: (i, 0)),
            ),
            compiler_params=pltpu.CompilerParams(
                dimension_semantics=("parallel",),
                vmem_limit_bytes=self._vmem_limit_bytes(
                    tm, single_buffer_weights),
            ),
            cost_estimate=pl.CostEstimate(
                flops=flops,
                transcendentals=Mp * H,
                bytes_accessed=bytes_accessed),
        )(x2, self.w1, self.b1, self.w2, self.b2)

    # ------------------------------------------------------------------ call

    def __call__(self, x):
        *lead, K = x.shape
        assert K == self.in_features
        H, O = self.hidden_features, self.out_features
        M = 1
        for d in lead:
            M *= d

        # Flatten tokens and feed bf16 straight to the kernel (packed loads,
        # single-pass MXU); feature dims stay lane-dense multiples of 128.
        x2 = jnp.reshape(x, (M, K)).astype(jnp.bfloat16)

        tm = self._choose_tm(M)
        Mp = pl.cdiv(M, tm) * tm
        if Mp != M:                       # ragged token counts (e.g. 197*B)
            x2 = jnp.pad(x2, ((0, Mp - M), (0, 0)))
        grid = (Mp // tm,)

        try:
            out = self._run(x2, tm, grid, single_buffer_weights=True)
        except Exception:
            # Older jax without BlockSpec(pipeline_mode=pl.Buffered(1)).
            out = self._run(x2, tm, grid, single_buffer_weights=False)

        if Mp != M:
            out = out[:M]
        return jnp.reshape(out, (*lead, O)).astype(x.dtype)


# ------------------------------ Reference (JAX) ------------------------------


def mlp_ref(x, w1_bf16, b1, w2_bf16, b2):
    """Pure-JAX reference with the same mixed precision as the kernel:
    bf16 single-pass matmuls with f32 accumulation, exact erf GELU in f32."""
    h = jnp.dot(x.astype(jnp.bfloat16), w1_bf16,
                preferred_element_type=jnp.float32) + b1
    h = jax.nn.gelu(h, approximate=False)
    h = h.astype(jnp.bfloat16)
    return jnp.dot(h, w2_bf16, preferred_element_type=jnp.float32) + b2


# ---------------------------------- main -------------------------------------


if __name__ == "__main__":
    key = jax.random.PRNGKey(0)
    kx, kp = jax.random.split(key)

    # ViT-like but small.  M = B*N = 200 tokens is NOT a multiple of the row
    # tile, exercising the cdiv + zero-padding path (like 197-token ViT seqs).
    B, N, IN, HID, OUT = 2, 100, 128, 256, 128
    x = jax.random.normal(kx, (B, N, IN), jnp.float32)

    mlp = MlpPallas(in_features=IN, hidden_features=HID, out_features=OUT,
                    drop=0.0, key=kp)
    out = jax.block_until_ready(mlp(x))
    ref = mlp_ref(x, mlp.w1, mlp.b1, mlp.w2, mlp.b2)

    assert out.shape == (B, N, OUT)
    # Tolerance covers the EUP-approx erf and bf16 rounding of the hidden
    # activation; both paths use identical bf16 single-pass matmuls.
    err = float(jnp.max(jnp.abs(out - ref)))
    assert jnp.allclose(out, ref, atol=2e-2, rtol=2e-2), (
        "max abs err = %g" % err)

    print("KERNEL_OK")
</pallas_src>

<mosaic_0001>
module attributes {stable_mosaic.version = 11 : i64} {
  func.func @_mlp_kernel(%arg0: i32, %arg1: memref<64x128xbf16, #tpu.memory_space<vmem>>, %arg2: memref<128x256xbf16, #tpu.memory_space<vmem>>, %arg3: memref<1x256xf32, #tpu.memory_space<vmem>>, %arg4: memref<256x128xbf16, #tpu.memory_space<vmem>>, %arg5: memref<1x128xf32, #tpu.memory_space<vmem>>, %arg6: memref<64x128xf32, #tpu.memory_space<vmem>>) attributes {dimension_semantics = [#tpu.dimension_semantics<parallel>], iteration_bounds = array<i64: 4>, scalar_prefetch = 0 : i64, scratch_operands = 0 : i64, tpu.core_type = #tpu.core_type<tc>, window_params = [{transform_indices = @transform_0, window_bounds = array<i64: 64, 128>}, {pipeline_mode = #tpu.pipeline_mode<synchronous>, transform_indices = @transform_1, window_bounds = array<i64: 128, 256>}, {pipeline_mode = #tpu.pipeline_mode<synchronous>, transform_indices = @transform_2, window_bounds = array<i64: 1, 256>}, {pipeline_mode = #tpu.pipeline_mode<synchronous>, transform_indices = @transform_3, window_bounds = array<i64: 256, 128>}, {pipeline_mode = #tpu.pipeline_mode<synchronous>, transform_indices = @transform_4, window_bounds = array<i64: 1, 128>}, {transform_indices = @transform_5, window_bounds = array<i64: 64, 128>}]} {
    %c0 = arith.constant 0 : index
    %c0_0 = arith.constant 0 : index
    %0 = vector.load %arg1[%c0, %c0_0] : memref<64x128xbf16, #tpu.memory_space<vmem>>, vector<64x128xbf16>
    %c0_1 = arith.constant 0 : index
    %c0_2 = arith.constant 0 : index
    %1 = vector.load %arg2[%c0_1, %c0_2] : memref<128x256xbf16, #tpu.memory_space<vmem>>, vector<128x256xbf16>
    %cst = arith.constant dense<0.000000e+00> : vector<64x256xf32>
    %2 = tpu.matmul %0, %1, %cst {dimension_numbers = #tpu.dot_dimension_numbers<[1], [0], [0], [1], [0, 0, 1, 1], [], []>} : vector<64x128xbf16>, vector<128x256xbf16>, vector<64x256xf32> -> vector<64x256xf32>
    %c0_3 = arith.constant 0 : index
    %c0_4 = arith.constant 0 : index
    %3 = vector.load %arg3[%c0_3, %c0_4] : memref<1x256xf32, #tpu.memory_space<vmem>>, vector<1x256xf32>
    %4 = vector.broadcast %3 : vector<1x256xf32> to vector<64x256xf32>
    %5 = arith.addf %2, %4 : vector<64x256xf32>
    %cst_5 = arith.constant 5.000000e-01 : f32
    %6 = vector.broadcast %cst_5 : f32 to vector<64x256xf32>
    %7 = arith.mulf %6, %5 : vector<64x256xf32>
    %cst_6 = arith.constant 0.707106769 : f32
    %8 = vector.broadcast %cst_6 : f32 to vector<64x256xf32>
    %9 = arith.mulf %5, %8 : vector<64x256xf32>
    %10 = math.absf %9 : vector<64x256xf32>
    %cst_7 = arith.constant 0.327591091 : f32
    %11 = vector.broadcast %cst_7 : f32 to vector<64x256xf32>
    %12 = arith.mulf %11, %10 : vector<64x256xf32>
    %cst_8 = arith.constant 1.000000e+00 : f32
    %13 = vector.broadcast %cst_8 : f32 to vector<64x256xf32>
    %14 = arith.addf %13, %12 : vector<64x256xf32>
    %15 = tpu.reciprocal %14 {approx = true} : vector<64x256xf32> -> vector<64x256xf32>
    %cst_9 = arith.constant 1.06140542 : f32
    %16 = vector.broadcast %cst_9 : f32 to vector<64x256xf32>
    %17 = arith.mulf %15, %16 : vector<64x256xf32>
    %cst_10 = arith.constant -1.45315206 : f32
    %18 = vector.broadcast %cst_10 : f32 to vector<64x256xf32>
    %19 = arith.addf %18, %17 : vector<64x256xf32>
    %20 = arith.mulf %15, %19 : vector<64x256xf32>
    %cst_11 = arith.constant 1.42141378 : f32
    %21 = vector.broadcast %cst_11 : f32 to vector<64x256xf32>
    %22 = arith.addf %21, %20 : vector<64x256xf32>
    %23 = arith.mulf %15, %22 : vector<64x256xf32>
    %cst_12 = arith.constant -0.284496725 : f32
    %24 = vector.broadcast %cst_12 : f32 to vector<64x256xf32>
    %25 = arith.addf %24, %23 : vector<64x256xf32>
    %26 = arith.mulf %15, %25 : vector<64x256xf32>
    %cst_13 = arith.constant 0.254829586 : f32
    %27 = vector.broadcast %cst_13 : f32 to vector<64x256xf32>
    %28 = arith.addf %27, %26 : vector<64x256xf32>
    %29 = arith.mulf %15, %28 : vector<64x256xf32>
    %cst_14 = arith.constant 0.000000e+00 : f32
    %30 = vector.broadcast %cst_14 : f32 to vector<64x256xf32>
    %31 = arith.subf %30, %10 : vector<64x256xf32>
    %32 = arith.mulf %31, %10 : vector<64x256xf32>
    %33 = math.exp %32 : vector<64x256xf32>
    %34 = arith.mulf %29, %33 : vector<64x256xf32>
    %cst_15 = arith.constant 1.000000e+00 : f32
    %35 = vector.broadcast %cst_15 : f32 to vector<64x256xf32>
    %36 = arith.subf %35, %34 : vector<64x256xf32>
    %cst_16 = arith.constant 0.000000e+00 : f32
    %37 = vector.broadcast %cst_16 : f32 to vector<64x256xf32>
    %38 = arith.cmpf oge, %9, %37 : vector<64x256xf32>
    %cst_17 = arith.constant 0.000000e+00 : f32
    %39 = vector.broadcast %cst_17 : f32 to vector<64x256xf32>
    %40 = arith.subf %39, %36 : vector<64x256xf32>
    %41 = arith.select %38, %36, %40 : vector<64x256xi1>, vector<64x256xf32>
    %cst_18 = arith.constant 1.000000e+00 : f32
    %42 = vector.broadcast %cst_18 : f32 to vector<64x256xf32>
    %43 = arith.addf %42, %41 : vector<64x256xf32>
    %44 = arith.mulf %7, %43 : vector<64x256xf32>
    %45 = arith.truncf %44 : vector<64x256xf32> to vector<64x256xbf16>
    %c0_19 = arith.constant 0 : index
    %c0_20 = arith.constant 0 : index
    %46 = vector.load %arg4[%c0_19, %c0_20] : memref<256x128xbf16, #tpu.memory_space<vmem>>, vector<256x128xbf16>
    %cst_21 = arith.constant dense<0.000000e+00> : vector<64x128xf32>
    %47 = tpu.matmul %45, %46, %cst_21 {dimension_numbers = #tpu.dot_dimension_numbers<[1], [0], [0], [1], [0, 0, 1, 1], [], []>} : vector<64x256xbf16>, vector<256x128xbf16>, vector<64x128xf32> -> vector<64x128xf32>
    %c0_22 = arith.constant 0 : index
    %c0_23 = arith.constant 0 : index
    %48 = vector.load %arg5[%c0_22, %c0_23] : memref<1x128xf32, #tpu.memory_space<vmem>>, vector<1x128xf32>
    %49 = vector.broadcast %48 : vector<1x128xf32> to vector<64x128xf32>
    %50 = arith.addf %47, %49 : vector<64x128xf32>
    %c0_24 = arith.constant 0 : index
    %c0_25 = arith.constant 0 : index
    %51 = vector.load %arg6[%c0_24, %c0_25] : memref<64x128xf32, #tpu.memory_space<vmem>>, vector<64x128xf32>
    tpu.vector_store %arg6[%c0_24, %c0_25], %50 {strides = array<i32>} : memref<64x128xf32, #tpu.memory_space<vmem>>, vector<64x128xf32>,
    return
  }
  func.func @transform_0(%arg0: i32) -> (i32, i32) {
    %c0_i32 = arith.constant 0 : i32
    %c0_i32_0 = arith.constant 0 : i32
    return %arg0, %c0_i32 : i32, i32
  }
  func.func @transform_1(%arg0: i32) -> (i32, i32) {
    %c0_i32 = arith.constant 0 : i32
    %c0_i32_0 = arith.constant 0 : i32
    %c0_i32_1 = arith.constant 0 : i32
    return %c0_i32, %c0_i32_0 : i32, i32
  }
  func.func @transform_2(%arg0: i32) -> (i32, i32) {
    %c0_i32 = arith.constant 0 : i32
    %c0_i32_0 = arith.constant 0 : i32
    %c0_i32_1 = arith.constant 0 : i32
    return %c0_i32, %c0_i32_0 : i32, i32
  }
  func.func @transform_3(%arg0: i32) -> (i32, i32) {
    %c0_i32 = arith.constant 0 : i32
    %c0_i32_0 = arith.constant 0 : i32
    %c0_i32_1 = arith.constant 0 : i32
    return %c0_i32, %c0_i32_0 : i32, i32
  }
  func.func @transform_4(%arg0: i32) -> (i32, i32) {
    %c0_i32 = arith.constant 0 : i32
    %c0_i32_0 = arith.constant 0 : i32
    %c0_i32_1 = arith.constant 0 : i32
    return %c0_i32, %c0_i32_0 : i32, i32
  }
  func.func @transform_5(%arg0: i32) -> (i32, i32) {
    %c0_i32 = arith.constant 0 : i32
    %c0_i32_0 = arith.constant 0 : i32
    return %arg0, %c0_i32 : i32, i32
  }
}

module attributes {stable_mosaic.version = 11 : i64} {
  func.func @_mlp_kernel(%arg0: i32, %arg1: memref<64x128xbf16, #tpu.memory_space<vmem>>, %arg2: memref<128x256xbf16, #tpu.memory_space<vmem>>, %arg3: memref<1x256xf32, #tpu.memory_space<vmem>>, %arg4: memref<256x128xbf16, #tpu.memory_space<vmem>>, %arg5: memref<1x128xf32, #tpu.memory_space<vmem>>, %arg6: memref<64x128xf32, #tpu.memory_space<vmem>>) attributes {dimension_semantics = [#tpu.dimension_semantics<parallel>], iteration_bounds = array<i64: 4>, scalar_prefetch = 0 : i64, scratch_operands = 0 : i64, tpu.core_type = #tpu.core_type<tc>, window_params = [{transform_indices = @transform_0, window_bounds = array<i64: 64, 128>}, {pipeline_mode = #tpu.pipeline_mode<synchronous>, transform_indices = @transform_1, window_bounds = array<i64: 128, 256>}, {pipeline_mode = #tpu.pipeline_mode<synchronous>, transform_indices = @transform_2, window_bounds = array<i64: 1, 256>}, {pipeline_mode = #tpu.pipeline_mode<synchronous>, transform_indices = @transform_3, window_bounds = array<i64: 256, 128>}, {pipeline_mode = #tpu.pipeline_mode<synchronous>, transform_indices = @transform_4, window_bounds = array<i64: 1, 128>}, {transform_indices = @transform_5, window_bounds = array<i64: 64, 128>}]} {
    %c0 = arith.constant 0 : index
    %c0_0 = arith.constant 0 : index
    %0 = vector.load %arg1[%c0, %c0_0] : memref<64x128xbf16, #tpu.memory_space<vmem>>, vector<64x128xbf16>
    %c0_1 = arith.constant 0 : index
    %c0_2 = arith.constant 0 : index
    %1 = vector.load %arg2[%c0_1, %c0_2] : memref<128x256xbf16, #tpu.memory_space<vmem>>, vector<128x256xbf16>
    %cst = arith.constant dense<0.000000e+00> : vector<64x256xf32>
    %2 = tpu.matmul %0, %1, %cst {dimension_numbers = #tpu.dot_dimension_numbers<[1], [0], [0], [1], [0, 0, 1, 1], [], []>} : vector<64x128xbf16>, vector<128x256xbf16>, vector<64x256xf32> -> vector<64x256xf32>
    %c0_3 = arith.constant 0 : index
    %c0_4 = arith.constant 0 : index
    %3 = vector.load %arg3[%c0_3, %c0_4] : memref<1x256xf32, #tpu.memory_space<vmem>>, vector<1x256xf32>
    %4 = vector.broadcast %3 : vector<1x256xf32> to vector<64x256xf32>
    %5 = arith.addf %2, %4 : vector<64x256xf32>
    %cst_5 = arith.constant 5.000000e-01 : f32
    %6 = vector.broadcast %cst_5 : f32 to vector<64x256xf32>
    %7 = arith.mulf %6, %5 : vector<64x256xf32>
    %cst_6 = arith.constant 0.707106769 : f32
    %8 = vector.broadcast %cst_6 : f32 to vector<64x256xf32>
    %9 = arith.mulf %5, %8 : vector<64x256xf32>
    %10 = math.absf %9 : vector<64x256xf32>
    %cst_7 = arith.constant 0.327591091 : f32
    %11 = vector.broadcast %cst_7 : f32 to vector<64x256xf32>
    %12 = arith.mulf %11, %10 : vector<64x256xf32>
    %cst_8 = arith.constant 1.000000e+00 : f32
    %13 = vector.broadcast %cst_8 : f32 to vector<64x256xf32>
    %14 = arith.addf %13, %12 : vector<64x256xf32>
    %15 = tpu.reciprocal %14 {approx = true} : vector<64x256xf32> -> vector<64x256xf32>
    %cst_9 = arith.constant 1.06140542 : f32
    %16 = vector.broadcast %cst_9 : f32 to vector<64x256xf32>
    %17 = arith.mulf %15, %16 : vector<64x256xf32>
    %cst_10 = arith.constant -1.45315206 : f32
    %18 = vector.broadcast %cst_10 : f32 to vector<64x256xf32>
    %19 = arith.addf %18, %17 : vector<64x256xf32>
    %20 = arith.mulf %15, %19 : vector<64x256xf32>
    %cst_11 = arith.constant 1.42141378 : f32
    %21 = vector.broadcast %cst_11 : f32 to vector<64x256xf32>
    %22 = arith.addf %21, %20 : vector<64x256xf32>
    %23 = arith.mulf %15, %22 : vector<64x256xf32>
    %cst_12 = arith.constant -0.284496725 : f32
    %24 = vector.broadcast %cst_12 : f32 to vector<64x256xf32>
    %25 = arith.addf %24, %23 : vector<64x256xf32>
    %26 = arith.mulf %15, %25 : vector<64x256xf32>
    %cst_13 = arith.constant 0.254829586 : f32
    %27 = vector.broadcast %cst_13 : f32 to vector<64x256xf32>
    %28 = arith.addf %27, %26 : vector<64x256xf32>
    %29 = arith.mulf %15, %28 : vector<64x256xf32>
    %cst_14 = arith.constant 0.000000e+00 : f32
    %30 = vector.broadcast %cst_14 : f32 to vector<64x256xf32>
    %31 = arith.subf %30, %10 : vector<64x256xf32>
    %32 = arith.mulf %31, %10 : vector<64x256xf32>
    %33 = math.exp %32 : vector<64x256xf32>
    %34 = arith.mulf %29, %33 : vector<64x256xf32>
    %cst_15 = arith.constant 1.000000e+00 : f32
    %35 = vector.broadcast %cst_15 : f32 to vector<64x256xf32>
    %36 = arith.subf %35, %34 : vector<64x256xf32>
    %cst_16 = arith.constant 0.000000e+00 : f32
    %37 = vector.broadcast %cst_16 : f32 to vector<64x256xf32>
    %38 = arith.cmpf oge, %9, %37 : vector<64x256xf32>
    %cst_17 = arith.constant 0.000000e+00 : f32
    %39 = vector.broadcast %cst_17 : f32 to vector<64x256xf32>
    %40 = arith.subf %39, %36 : vector<64x256xf32>
    %41 = arith.select %38, %36, %40 : vector<64x256xi1>, vector<64x256xf32>
    %cst_18 = arith.constant 1.000000e+00 : f32
    %42 = vector.broadcast %cst_18 : f32 to vector<64x256xf32>
    %43 = arith.addf %42, %41 : vector<64x256xf32>
    %44 = arith.mulf %7, %43 : vector<64x256xf32>
    %45 = arith.truncf %44 : vector<64x256xf32> to vector<64x256xbf16>
    %c0_19 = arith.constant 0 : index
    %c0_20 = arith.constant 0 : index
    %46 = vector.load %arg4[%c0_19, %c0_20] : memref<256x128xbf16, #tpu.memory_space<vmem>>, vector<256x128xbf16>
    %cst_21 = arith.constant dense<0.000000e+00> : vector<64x128xf32>
    %47 = tpu.matmul %45, %46, %cst_21 {dimension_numbers = #tpu.dot_dimension_numbers<[1], [0], [0], [1], [0, 0, 1, 1], [], []>} : vector<64x256xbf16>, vector<256x128xbf16>, vector<64x128xf32> -> vector<64x128xf32>
    %c0_22 = arith.constant 0 : index
    %c0_23 = arith.constant 0 : index
    %48 = vector.load %arg5[%c0_22, %c0_23] : memref<1x128xf32, #tpu.memory_space<vmem>>, vector<1x128xf32>
    %49 = vector.broadcast %48 : vector<1x128xf32> to vector<64x128xf32>
    %50 = arith.addf %47, %49 : vector<64x128xf32>
    %c0_24 = arith.constant 0 : index
    %c0_25 = arith.constant 0 : index
    %51 = vector.load %arg6[%c0_24, %c0_25] : memref<64x128xf32, #tpu.memory_space<vmem>>, vector<64x128xf32>
    tpu.vector_store %arg6[%c0_24, %c0_25], %50 {strides = array<i32>} : memref<64x128xf32, #tpu.memory_space<vmem>>, vector<64x128xf32>,
    return
  }
  func.func @transform_0(%arg0: i32) -> (i32, i32) {
    %c0_i32 = arith.constant 0 : i32
    %c0_i32_0 = arith.constant 0 : i32
    return %arg0, %c0_i32 : i32, i32
  }
  func.func @transform_1(%arg0: i32) -> (i32, i32) {
    %c0_i32 = arith.constant 0 : i32
    %c0_i32_0 = arith.constant 0 : i32
    %c0_i32_1 = arith.constant 0 : i32
    return %c0_i32, %c0_i32_0 : i32, i32
  }
  func.func @transform_2(%arg0: i32) -> (i32, i32) {
    %c0_i32 = arith.constant 0 : i32
    %c0_i32_0 = arith.constant 0 : i32
    %c0_i32_1 = arith.constant 0 : i32
    return %c0_i32, %c0_i32_0 : i32, i32
  }
  func.func @transform_3(%arg0: i32) -> (i32, i32) {
    %c0_i32 = arith.constant 0 : i32
    %c0_i32_0 = arith.constant 0 : i32
    %c0_i32_1 = arith.constant 0 : i32
    return %c0_i32, %c0_i32_0 : i32, i32
  }
  func.func @transform_4(%arg0: i32) -> (i32, i32) {
    %c0_i32 = arith.constant 0 : i32
    %c0_i32_0 = arith.constant 0 : i32
    %c0_i32_1 = arith.constant 0 : i32
    return %c0_i32, %c0_i32_0 : i32, i32
  }
  func.func @transform_5(%arg0: i32) -> (i32, i32) {
    %c0_i32 = arith.constant 0 : i32
    %c0_i32_0 = arith.constant 0 : i32
    return %arg0, %c0_i32 : i32, i32
  }
}

</mosaic_0001>

<bundles_post_ra>
// kernel: tpu_custom_call.1
= control target key start
LH: loop header
LB: loop body
LE: loop exit
PB: predicated region body
PF: predicated region fallthrough
CT: control target
= control target key end

     0   :  { %10 = vsyncpa [#allocation3], 0  ;;  %s2333_s0 = inlined_call_operand.hbm [shape: bf16[256,128], index: 0, kind: input, shape index: {}]   ;;  %s2334_s1 = inlined_call_operand.hbm [shape: bf16[128,256], index: 1, kind: input, shape index: {}]   ;;  %s2335_s2 = inlined_call_operand.hbm [shape: f32[1,256], index: 2, kind: input, shape index: {}]   ;;  %s2336_s3 = inlined_call_operand.hbm [shape: bf16[256,128], index: 3, kind: input, shape index: {}]   ;;  %s2337_s4 = inlined_call_operand.vmem [shape: f32[1,128], index: 4, kind: input, shape index: {}]   ;;  %s2338_s5 = inlined_call_operand.hbm [shape: f32[256,128], index: 5, kind: output, shape index: {}]  }
   0x1   :  { %12 = vsyncpa [#allocation3 + $0x1], 0 }
   0x2   :  { %13 = vsyncpa [#allocation6], 0 }
   0x3   :  { %14 = vsyncpa [#allocation9], 0 }
   0x4   :  { %15 = vsyncpa [#allocation4], 0 }
   0x5   :  { %17 = vsyncpa [#allocation4 + $0x1], 0  ;;  %s1812_s18 = smov 0   ;;  %s1814_s19 = smov 0  }
   0x6   :  { %s1816_s20 = smov 0   ;;  %s1818_s21 = smov 0  }
   0x7 LB: > { %s1833_s22 = sadd.s32 4294967295, %s1771_s21   ;;  %s1227_s23 = sadd.s32 4294967294, %s1771_s21   ;;  %s1771_s21 = sphi %s1818_s21, %s2380_s21   ;;  %s1767_s20 = sphi %s1816_s20, %s2379_s20   ;;  %s1763_s19 = sphi %s1814_s19, %s2378_s19   ;;  %s1759_s18 = sphi %s1812_s18, %s2377_s18  }
   0x8   : > { %p43_p0 = scmp.ne.s32.totalorder %s1763_s19, %s1759_s18  ;;  %p44_p1 = scmp.eq.s32.totalorder %s1833_s22, 0 }
   0x9   : > { %p151_p2 = scmp.eq.s32.totalorder %s1833_s22, 3  ;;  %p157_p3 = scmp.eq.s32.totalorder %s1227_s23, 3 }
   0xa   : > { %p1842_p4 = por %p44_p1, %p43_p0  ;;  %p1228_p5 = scmp.ge.s32.totalorder %s1771_s21, 1 }
   0xb   : > { %p1847_p6 = por %p157_p3, %p43_p0  ;;  %p164_p7 = scmp.lt.s32.totalorder %s1771_s21, 5 }
   0xc   : > { %s175_s28 = sshll.u32 %s2334_s1, 4  ;;  %s1773_s30 = smov [#allocation5]   ;;  %s176_s28 = int_to_ptr.hbm [resolvable:$true] %s175_s28 }
   0xd   : > { %p1855_p8 = pnand %p1228_p5, %p164_p7  ;;  %s177_s6 = sshll.u32 %s1773_s30, 4  ;;  %s178_s6 = int_to_ptr.vmem [resolvable:$true] %s177_s6 }
   0xe   : > { %s190_s10 = sshll.u32 %s2335_s2, 4  ;;  %s1774_s11 = smov 128   ;;  %s191_s10 = int_to_ptr.hbm [resolvable:$true] %s190_s10 }
   0xf   : > { %p1445_p9 = pneg %p1855_p8  ;;  %s1775_s12 = smov 8  }
  0x10   : > { %s1776_s13 = smov [#allocation7]   ;;  %s201_s17 = sshll.u32 %s2336_s3, 4  ;;  %s202_s17 = int_to_ptr.hbm [resolvable:$true] %s201_s17 }
  0x11   : > { %p1863_p10 = pnand %p1445_p9, %p44_p1  ;;  %s192_s14 = sshll.u32 %s1776_s13, 4  ;;  %s193_s14 = int_to_ptr.vmem [resolvable:$true] %s192_s14 }
  0x12   : > { %s1777_s23 = smov [#allocation8]   ;;  %s2339_s27 = smov 64  }
  0x13   : > { %1448 = dma.hbm_to_vmem [thread:$0]  (!%p1863_p10), %s176_s28, 2048, %s178_s6, [#allocation6], %s1774_s11, %s1774_s11, %s1775_s12  }
  0x14   : > { %1451 = dma.hbm_to_vmem [thread:$0]  (!%p1863_p10), %s191_s10, 32, %s193_s14, [#allocation6]  }
  0x15   : > { %s203_s26 = sshll.u32 %s1777_s23, 4  ;;  %s1779_s28 = smov 4   ;;  %s204_s26 = int_to_ptr.vmem [resolvable:$true] %s203_s26 }
  0x16   : > { %1454 = dma.hbm_to_vmem [thread:$0]  (!%p1863_p10), %s202_s17, 2048, %s204_s26, [#allocation9], %s2339_s27, %s2339_s27, %s1779_s28  }
  0x17   : > { %s1883_s30 = sadd.s32 1, %s1771_s21   ;;  %s30_s8 = sadd.s32 1, %s1767_s20 }
  0x18   : > { %s27_s6 = ssub.s32 %s1771_s21, %s1883_s30  ;;  %p37_p12 = scmp.ne.s32.totalorder %s1767_s20, %s1763_s19 }
  0x19   : > { %p28_p11 = scmp.eq.s32.totalorder %s27_s6, 0  ;;  %p38_p13 = scmp.eq.s32.totalorder %s1771_s21, 0 }
  0x1a   : > { %p1896_p0 = por %p151_p2, %p37_p12  ;;  %p1466_p3 = scmp.lt.s32.totalorder %s1771_s21, 4 }
  0x1b   : > { %s1892_s9 = scalar_select %p28_p11, %s1767_s20, %s30_s8  }
  0x1c   : > { %s220_s7 = sand.u32 1, %s1767_s20   ;;  %s1391_s11 = sshll.u32 %s1771_s21, 5 }
  0x1d   : > { %p39_p5 = por %p38_p13, %p37_p12  ;;  %s1233_s12 = sshll.u32 %s220_s7, 5 }
  0x1e   : > { %s229_s15 = scalar_lea.hbm %s2333_s0, %s1391_s11  ;;  %s224_s17 = scalar_lea.vmem [#allocation2], %s1233_s12 }
  0x1f   : > { %s230_s16 = sshll.u32 %s229_s15, 4  ;;  %s232_s23 = sshll.u32 %s224_s17, 4  ;;  %s231_s16 = int_to_ptr.hbm [resolvable:$true] %s230_s16  ;;  %s233_s23 = int_to_ptr.vmem [resolvable:$true] %s232_s23 }
  0x20   : > { %p1906_p7 = pnand %p1466_p3, %p39_p5  ;;  %s221_s6 = scalar_lea.sflag [#allocation3], %s220_s7 }
  0x21   : > { %s1667_s8 = sshra.s32 %s231_s16, 4  ;;  %s1674_s12 = scalar_lea.hbm %s2333_s0, 128  ;;  %s1668_s8 = int_to_ptr.hbm [resolvable:$true] %s1667_s8 }
  0x22   : > { %s1669_s27 = scalar_lea.hbm %s1668_s8, 32  ;;  %p1671_p9 = pneg %p1906_p7 }
  0x23   : > { %p1670_p2 = scmp.ne.s32.totalorder %s1668_s8, %s1669_s27  ;;  %p1675_p12 = scmp.lt.s32.totalorder %s1668_s8, %s2333_s0 }
  0x24   : > { %p1676_p13 = scmp.lt.s32.totalorder %s1674_s12, %s1669_s27 }
  0x25   : > { %p1672_p10 = pnand %p1671_p9, %p1670_p2 }
  0x26   : > { %p1677_p3 = por %p1676_p13, %p1675_p12 }
  0x27   : > { %p1673_p11 = pneg %p1672_p10 }
  0x29   : > { %p1678_p5 = pnand %p1677_p3, %p1673_p11 }
  0x2b   : > { %1681 = shalt.err (!%p1678_p5)
}
  0x2c   : > { %s2354_s7 = smov 64   ;;  %244 = sbr.rel (%p1855_p8) target bundleno = 495 (0x1ef), region = 40 }
  0x2d   : > { %1458 = dma.hbm_to_vmem [thread:$0]  (!%p1906_p7), %s231_s16, 512, %s233_s23, %s221_s6, %s2354_s7, %s2354_s7, %s1779_s28  }
  0x31   : > { %s1926_s17 = sand.u32 1, %s1763_s19  }
  0x32   : > { %s1237_s8 = sshll.u32 %s1926_s17, 5  ;;  %s247_s27 = scalar_lea.sflag [#allocation3], %s1926_s17 }
  0x33   : > { %s1930_s11 = scalar_lea.vmem [#allocation2], %s1237_s8 }
  0x34   : > { %1742 = dma.done.wait (%p1842_p4), %s247_s27, 512  }
  0x35   : > { %1744 = vsyncadd (%p1842_p4), %s247_s27, 4294966784 }
  0x36   : > { %1746 = dma.done.wait (%p44_p1), [#allocation6], 2080  }
  0x37   : > { %1748 = vsyncadd (%p44_p1), [#allocation6], 4294965216 }
  0x38   : > { %1750 = dma.done.wait (%p44_p1), [#allocation9], 2048  }
  0x39   : > { %1752 = vsyncadd (%p44_p1), [#allocation9], 4294965248  ;;  %v1316_v0 = vld [vmem:[#allocation5 + $0x70] sm:$0xf]  ;;  %v1411_v1 = vld [vmem:[#allocation5 + $0x74] sm:$0xf0] }
  0x3a   : > { %v1410_v2 = vld [vmem:[#allocation5 + $0x74] sm:$0xf]  ;;  %v1317_v3 = vor.u32 %v1411_v1, %v1316_v0  ;;  %v1318_v4 = vld [vmem:[#allocation5 + $0x78] sm:$0xf0]  ;;  %v1308_v5 = vld [vmem:[#allocation5 + $0x60] sm:$0xf] }
  0x3b   : > { %v1409_v6 = vld [vmem:[#allocation5 + $0x64] sm:$0xf0]  ;;  %v1321_v7 = vor.u32 %v1410_v2, %v1318_v4  ;;  %v1408_v8 = vld [vmem:[#allocation5 + $0x64] sm:$0xf]  ;;  %v1310_v9 = vld [vmem:[#allocation5 + $0x68] sm:$0xf0] }
  0x3c   : > { %429 = vmatpush.bf16.msra.mxu0 %v1317_v3  ;;  %v1309_v10 = vor.u32 %v1409_v6, %v1308_v5  ;;  %v1313_v11 = vor.u32 %v1408_v8, %v1310_v9  ;;  %v1300_v12 = vld [vmem:[#allocation5 + $0x50] sm:$0xf]  ;;  %v1407_v13 = vld [vmem:[#allocation5 + $0x54] sm:$0xf0]  ;;  %v1406_v14 = vld [vmem:[#allocation5 + $0x54] sm:$0xf] }
  0x3d   : > { %458 = vmatpush.bf16.msra.mxu1 %v1321_v7  ;;  %v1302_v15 = vld [vmem:[#allocation5 + $0x58] sm:$0xf0]  ;;  %v1301_v16 = vor.u32 %v1407_v13, %v1300_v12  ;;  %v1292_v18 = vld [vmem:[#allocation5 + $0x40] sm:$0xf]  ;;  %v1405_v19 = vld [vmem:[#allocation5 + $0x44] sm:$0xf0] }
  0x3e   : > { %v1305_v17 = vor.u32 %v1406_v14, %v1302_v15  ;;  %v1404_v20 = vld [vmem:[#allocation5 + $0x44] sm:$0xf]  ;;  %v1294_v21 = vld [vmem:[#allocation5 + $0x48] sm:$0xf0]  ;;  %v1293_v22 = vor.u32 %v1405_v19, %v1292_v18  ;;  %v1284_v24 = vld [vmem:[#allocation5 + $0x30] sm:$0xf] }
  0x3f   : > { %v1297_v23 = vor.u32 %v1404_v20, %v1294_v21  ;;  %v1403_v25 = vld [vmem:[#allocation5 + $0x34] sm:$0xf0]  ;;  %v1402_v26 = vld [vmem:[#allocation5 + $0x34] sm:$0xf]  ;;  %v1286_v27 = vld [vmem:[#allocation5 + $0x38] sm:$0xf0] }
  0x40   : > { %430 = vmatpush.bf16.msra.mxu0 %v1309_v10  ;;  %v1285_v28 = vor.u32 %v1403_v25, %v1284_v24  ;;  %v1289_v29 = vor.u32 %v1402_v26, %v1286_v27  ;;  %v1276_v30 = vld [vmem:[#allocation5 + $0x20] sm:$0xf]  ;;  %v1401_v31 = vld [vmem:[#allocation5 + $0x24] sm:$0xf0]  ;;  %v1400_v32 = vld [vmem:[#allocation5 + $0x24] sm:$0xf] }
  0x41   : > { %459 = vmatpush.bf16.msra.mxu1 %v1313_v11  ;;  %v1278_v33 = vld [vmem:[#allocation5 + $0x28] sm:$0xf0]  ;;  %v1277_v34 = vor.u32 %v1401_v31, %v1276_v30  ;;  %v1268_v36 = vld [vmem:[#allocation5 + $0x10] sm:$0xf]  ;;  %v1399_v37 = vld [vmem:[#allocation5 + $0x14] sm:$0xf0] }
  0x42   : > { %v1281_v35 = vor.u32 %v1400_v32, %v1278_v33  ;;  %v1398_v38 = vld [vmem:[#allocation5 + $0x14] sm:$0xf]  ;;  %v1270_v39 = vld [vmem:[#allocation5 + $0x18] sm:$0xf0]  ;;  %v1269_v40 = vor.u32 %v1399_v37, %v1268_v36  ;;  %v1260_v42 = vld [vmem:[#allocation5] sm:$0xf] }
  0x43   : > { %v1273_v41 = vor.u32 %v1398_v38, %v1270_v39  ;;  %v1397_v43 = vld [vmem:[#allocation5 + $0x4] sm:$0xf0]  ;;  %v1396_v44 = vld [vmem:[#allocation5 + $0x4] sm:$0xf]  ;;  %v1262_v45 = vld [vmem:[#allocation5 + $0x8] sm:$0xf0] }
  0x44   : > { %431 = vmatpush.bf16.msra.mxu0 %v1301_v16  ;;  %v1261_v46 = vor.u32 %v1397_v43, %v1260_v42  ;;  %v1265_v47 = vor.u32 %v1396_v44, %v1262_v45  ;;  %v1392_v48 = vld [vmem:[%s1930_s11] sm:$0xff]  ;;  %v1393_v49 = vld [vmem:[%s1930_s11 + $0x8] sm:$0xff]  ;;  %v1394_v50 = vld [vmem:[%s1930_s11 + $0x10] sm:$0xff]  ;;  %s1241_s28 = sshll.u32 %s1926_s17, 6  ;;  %s1428_s23 = sshll.u32 %s1833_s22, 6 }
  0x45   : > { %460 = vmatpush.bf16.msra.mxu1 %v1305_v17  ;;  %v1395_v51 = vld [vmem:[%s1930_s11 + $0x18] sm:$0xff]  ;;  %v319_v54 = vld [vmem:[#allocation7] sm:$0x3]  ;;  %v1417_v62 = vld [vmem:[#allocation8 + $0x28] sm:$0xff]  ;;  %s2290_s16 = scalar_lea.vmem [#allocation10], %s1241_s28  ;;  %s1121_s13 = scalar_lea.hbm %s2338_s5, %s1428_s23 }
  0x46   : > { %v1419_v52 = vld [vmem:[#allocation8 + $0x38] sm:$0xff]  ;;  %v1948_v55 = vperm.slane %v319_v54, 0  ;;  %v1418_v56 = vld [vmem:[#allocation8 + $0x30] sm:$0xff]  ;;  %v1950_v58 = vperm.slane %v319_v54, 1  ;;  %v1425_v63 = vld [vmem:[#allocation8 + $0x68] sm:$0xff]  ;;  %s1122_s12 = sshll.u32 %s2290_s16, 4  ;;  %s1123_s12 = int_to_ptr.vmem [resolvable:$true] %s1122_s12 }
  0x47   : > { %v1427_v53 = vld [vmem:[#allocation8 + $0x78] sm:$0xff]  ;;  %1043 = vmatpush.bf16.msra.mxu2 %v1419_v52  ;;  %v1426_v57 = vld [vmem:[#allocation8 + $0x70] sm:$0xff]  ;;  %v1416_v3 = vld [vmem:[#allocation8 + $0x20] sm:$0xff]  ;;  %s1124_s14 = sshll.u32 %s1121_s13, 4  ;;  %s1110_s15 = scalar_lea.sflag [#allocation4], %s1926_s17  ;;  %s1125_s14 = int_to_ptr.hbm [resolvable:$true] %s1124_s14 }
  0x48   : > { %432 = vmatpush.bf16.msra.mxu0 %v1293_v22  ;;  %1072 = vmatpush.bf16.msra.mxu3 %v1427_v53  ;;  %v1424_v4 = vld [vmem:[#allocation8 + $0x60] sm:$0xff]  ;;  %v1415_v11 = vld [vmem:[#allocation8 + $0x18] sm:$0xff]  ;;  %v1414_v17 = vld [vmem:[#allocation8 + $0x10] sm:$0xff]  ;;  %s1711_s7 = sshra.s32 %s1125_s14, 4  ;;  %s1717_s11 = scalar_lea.hbm %s2338_s5, 256  ;;  %s1712_s7 = int_to_ptr.hbm [resolvable:$true] %s1711_s7 }
  0x49   : > { %461 = vmatpush.bf16.msra.mxu1 %v1297_v23  ;;  %v1423_v12 = vld [vmem:[#allocation8 + $0x58] sm:$0xff]  ;;  %v1422_v18 = vld [vmem:[#allocation8 + $0x50] sm:$0xff]  ;;  %v1421_v30 = vld [vmem:[#allocation8 + $0x48] sm:$0xff]  ;;  %s1713_s22 = scalar_lea.hbm %s1712_s7, 64  ;;  %p1718_p7 = scmp.lt.s32.totalorder %s1712_s7, %s2338_s5 }
  0x4a   : > { %v1412_v38 = vld [vmem:[#allocation8] sm:$0xff]  ;;  %p1714_p1 = scmp.ne.s32.totalorder %s1712_s7, %s1713_s22  ;;  %p1719_p2 = scmp.lt.s32.totalorder %s1717_s11, %s1713_s22 }
  0x4b   : > { %1044 = vmatpush.bf16.msra.mxu2 %v1418_v56  ;;  %v1420_v39 = vld [vmem:[#allocation8 + $0x40] sm:$0xff] }
  0x4c   : > { %433 = vmatpush.bf16.msra.mxu0 %v1285_v28  ;;  %1073 = vmatpush.bf16.msra.mxu3 %v1426_v57  ;;  %p1715_p4 = pnand %p1714_p1, %p1896_p0  ;;  %p1720_p9 = por %p1719_p2, %p1718_p7 }
  0x4d   : > { %462 = vmatpush.bf16.msra.mxu1 %v1289_v29  ;;  %v1413_v29 = vld [vmem:[#allocation8 + $0x8] sm:$0xff] }
  0x4e   : > { %p1716_p8 = pneg %p1715_p4 }
  0x4f   : > { %1045 = vmatpush.bf16.msra.mxu2 %v1417_v62 }
  0x50   : > { %434 = vmatpush.bf16.msra.mxu0 %v1277_v34  ;;  %1074 = vmatpush.bf16.msra.mxu3 %v1425_v63  ;;  %p1721_p10 = pnand %p1720_p9, %p1716_p8 }
  0x51   : > { %463 = vmatpush.bf16.msra.mxu1 %v1281_v35 }
  0x53   : > { %1046 = vmatpush.bf16.msra.mxu2 %v1416_v3 }
  0x54   : > { %435 = vmatpush.bf16.msra.mxu0 %v1269_v40  ;;  %1075 = vmatpush.bf16.msra.mxu3 %v1424_v4 }
  0x55   : > { %464 = vmatpush.bf16.msra.mxu1 %v1273_v41 }
  0x57   : > { %1047 = vmatpush.bf16.msra.mxu2 %v1415_v11 }
  0x58   : > { %436 = vmatpush.bf16.msra.mxu0 %v1261_v46  ;;  %1076 = vmatpush.bf16.msra.mxu3 %v1423_v12 }
  0x59   : > { %465 = vmatpush.bf16.msra.mxu1 %v1265_v47 }
  0x5b   : > { %437 = vmatmul.bf16.vlgmr.msra.gmra.mxu0 %v1392_v48  ;;  %1048 = vmatpush.bf16.msra.mxu2 %v1414_v17 }
  0x5c   : > { %466 = vmatmul.bf16.vlgmr.msra.gmra.mxu1 %v1392_v48  ;;  %1077 = vmatpush.bf16.msra.mxu3 %v1422_v18 }
  0x5f   : > { %1049 = vmatpush.bf16.msra.mxu2 %v1413_v29 }
  0x60   : > { %1078 = vmatpush.bf16.msra.mxu3 %v1421_v30 }
  0x63   : > { %1050 = vmatpush.bf16.msra.mxu2 %v1412_v38 }
  0x64   : > { %1079 = vmatpush.bf16.msra.mxu3 %v1420_v39 }
  0x6b   : > { %442 = vmatmul.bf16.gmra.mxu0 %v1393_v49 }
  0x6c   : > { %471 = vmatmul.bf16.gmra.mxu1 %v1393_v49 }
  0x7b   : > { %447 = vmatmul.bf16.gmra.mxu0 %v1394_v50 }
  0x7c   : > { %476 = vmatmul.bf16.gmra.mxu1 %v1394_v50 }
  0x8b   : > { %452 = vmatmul.bf16.gmra.mxu0 %v1395_v51 }
  0x8c   : > { %481 = vmatmul.bf16.gmra.mxu1 %v1395_v51 }
  0xd8   : > { %v438_v59 = vpop.f32.mrf.mxu0 }
  0xd9   : > { %v1953_v60 = vadd.f32 %v438_v59, %v1948_v55  ;;  %v467_v61 = vpop.f32.mrf.mxu1 }
  0xda   : > { %v1959_v1 = vadd.f32 %v467_v61, %v1950_v58 }
  0xdb   : > { %v1956_v0 = vmul.f32 0.70710677, %v1953_v60  ;;  %v1990_v56 = vmul.f32 0.5, %v1953_v60 }
  0xdc   : > { %v1963_v6 = vmul.f32 0.70710677, %v1959_v1  ;;  %v1993_v57 = vmul.f32 0.5, %v1959_v1 }
  0xdd   : > { %v519_v2 = vand.u32 2147483647, %v1956_v0  ;;  %vm823_vm0 = vcmp.ge.f32.partialorder %v1956_v0, 0.0 }
  0xde   : > { %v520_v13 = vand.u32 2147483647, %v1963_v6  ;;  %vm824_vm2 = vcmp.ge.f32.partialorder %v1963_v6, 0.0 }
  0xdf   : > { %v535_v5 = vmul.f32 0.3275911, %v519_v2  ;;  %v727_v22 = vsub.f32 0.0, %v519_v2 }
  0xe0   : > { %v440_v7 = vpop.f32.mrf.mxu0  ;;  %v536_v19 = vmul.f32 0.3275911, %v520_v13  ;;  %v728_v25 = vsub.f32 0.0, %v520_v13 }
  0xe1   : > { %v551_v8 = vadd.f32 1.0, %v535_v5  ;;  %v441_v9 = vadd.f32 %v440_v7, %v1948_v55  ;;  %v469_v10 = vpop.f32.mrf.mxu1  ;;  %v743_v34 = vmul.f32 %v727_v22, %v519_v2 }
  0xe2   : > { %v470_v15 = vadd.f32 %v469_v10, %v1950_v58  ;;  %v552_v32 = vadd.f32 1.0, %v536_v19  ;;  %v744_v36 = vmul.f32 %v728_v25, %v520_v13 }
  0xe3   : > { %1513 = vrcp.f32 %v551_v8  ;;  %v1967_v14 = vmul.f32 0.70710677, %v441_v9  ;;  %v759_v43 = vmul.f32 1.442695, %v743_v34  ;;  %v1996_v62 = vmul.f32 0.5, %v441_v9 }
  0xe4   : > { %v1971_v21 = vmul.f32 0.70710677, %v470_v15  ;;  %v761_v47 = vmul.f32 1.442695, %v744_v36  ;;  %v1998_v63 = vmul.f32 0.5, %v470_v15 }
  0xe5   : > { %v521_v16 = vand.u32 2147483647, %v1967_v14  ;;  %vm825_vm1 = vcmp.ge.f32.partialorder %v1967_v14, 0.0 }
  0xe6   : > { %v522_v33 = vand.u32 2147483647, %v1971_v21  ;;  %vm826_vm3 = vcmp.ge.f32.partialorder %v1971_v21, 0.0 }
  0xe7   : > { %v537_v20 = vmul.f32 0.3275911, %v521_v16  ;;  %v729_v40 = vsub.f32 0.0, %v521_v16 }
  0xe8   : > { %v443_v23 = vpop.f32.mrf.mxu0  ;;  %v730_v42 = vsub.f32 0.0, %v522_v33  ;;  %v538_v52 = vmul.f32 0.3275911, %v522_v33 }
  0xe9   : > { %v1973_v24 = vpop.eup %1513  ;;  %v553_v26 = vadd.f32 1.0, %v537_v20  ;;  %v444_v27 = vadd.f32 %v443_v23, %v1948_v55  ;;  %v472_v28 = vpop.f32.mrf.mxu1  ;;  %v745_v51 = vmul.f32 %v729_v40, %v521_v16 }
  0xea   : > { %v583_v31 = vmul.f32 1.0614054, %v1973_v24  ;;  %v473_v35 = vadd.f32 %v472_v28, %v1950_v58  ;;  %v746_v59 = vmul.f32 %v730_v42, %v522_v33  ;;  %v554_v1 = vadd.f32 1.0, %v538_v52 }
  0xeb   : > { %1515 = vrcp.f32 %v553_v26  ;;  %v1979_v37 = vmul.f32 0.70710677, %v444_v27  ;;  %v763_v7 = vmul.f32 1.442695, %v745_v51  ;;  %v2005_v12 = vmul.f32 0.5, %v444_v27 }
  0xec   : > { %v599_v41 = vadd.f32 -1.4531521, %v583_v31  ;;  %1517 = vrcp.f32 %v552_v32  ;;  %v1981_v44 = vmul.f32 0.70710677, %v473_v35  ;;  %v765_v11 = vmul.f32 1.442695, %v746_v59 }
  0xed   : > { %v523_v48 = vand.u32 2147483647, %v1979_v37  ;;  %1519 = vpow2.f32 %v759_v43  ;;  %v2021_v32 = vmul.f32 0.5, %v473_v35  ;;  %vm827_vm4 = vcmp.ge.f32.partialorder %v1979_v37, 0.0 }
  0xee   : > { %v615_v54 = vmul.f32 %v1973_v24, %v599_v41  ;;  %v524_v2 = vand.u32 2147483647, %v1981_v44  ;;  %1521 = vpow2.f32 %v761_v47  ;;  %vm828_vm6 = vcmp.ge.f32.partialorder %v1981_v44, 0.0 }
  0xef   : > { %v539_v4 = vmul.f32 0.3275911, %v523_v48  ;;  %v731_v8 = vsub.f32 0.0, %v523_v48  ;;  %1523 = vrcp.f32 %v554_v1 }
  0xf0   : > { %v445_v45 = vpop.f32.mrf.mxu0  ;;  %v631_v10 = vadd.f32 1.4214138, %v615_v54  ;;  %v540_v15 = vmul.f32 0.3275911, %v524_v2  ;;  %v732_v16 = vsub.f32 0.0, %v524_v2  ;;  %1525 = vpow2.f32 %v763_v7 }
  0xf1   : > { %v1983_v46 = vpop.eup %1515  ;;  %v446_v49 = vadd.f32 %v445_v45, %v1948_v55  ;;  %v474_v50 = vpop.f32.mrf.mxu1  ;;  %v555_v20 = vadd.f32 1.0, %v539_v4  ;;  %v747_v28 = vmul.f32 %v731_v8, %v523_v48  ;;  %1527 = vpow2.f32 %v765_v11 }
  0xf2   : > { %v585_v53 = vmul.f32 1.0614054, %v1983_v46  ;;  %v475_v61 = vadd.f32 %v474_v50, %v1950_v58  ;;  %v2001_v3 = vpop.eup %1517  ;;  %v647_v18 = vmul.f32 %v1973_v24, %v631_v10  ;;  %v556_v36 = vadd.f32 1.0, %v540_v15 }
  0xf3   : > { %v2003_v5 = vmul.f32 0.70710677, %v446_v49  ;;  %v584_v19 = vmul.f32 1.0614054, %v2001_v3  ;;  %v1520_v27 = vpop.eup %1519  ;;  %v748_v38 = vmul.f32 %v732_v16, %v524_v2  ;;  %1529 = vrcp.f32 %v555_v20 }
  0xf4   : > { %v601_v60 = vadd.f32 -1.4531521, %v585_v53  ;;  %v2007_v9 = vmul.f32 0.70710677, %v475_v61  ;;  %v663_v30 = vadd.f32 -0.28449672, %v647_v18  ;;  %v2019_v31 = vpop.eup %1521  ;;  %1531 = vrcp.f32 %v556_v36 }
  0xf5   : > { %v525_v22 = vand.u32 2147483647, %v2003_v5  ;;  %v600_v42 = vadd.f32 -1.4531521, %v584_v19  ;;  %v767_v43 = vmul.f32 1.442695, %v747_v28  ;;  %v2036_v53 = vpop.eup %1523 }
  0xf6   : > { %v617_v13 = vmul.f32 %v1983_v46, %v601_v60  ;;  %v526_v33 = vand.u32 2147483647, %v2007_v9  ;;  %v679_v47 = vmul.f32 %v1973_v24, %v663_v30  ;;  %v2033_v48 = vmul.f32 0.5, %v446_v49  ;;  %v1526_v60 = vpop.eup %1525 }
  0xf7   : > { %v541_v40 = vmul.f32 0.3275911, %v525_v22  ;;  %v733_v45 = vsub.f32 0.0, %v525_v22  ;;  %v769_v54 = vmul.f32 1.442695, %v748_v38  ;;  %v2038_v1 = vmul.f32 0.5, %v475_v61  ;;  %v2042_v11 = vpop.eup %1527 }
  0xf8   : > { %v448_v17 = vpop.f32.mrf.mxu0  ;;  %v633_v26 = vadd.f32 1.4214138, %v617_v13  ;;  %v734_v50 = vsub.f32 0.0, %v526_v33  ;;  %v542_v59 = vmul.f32 0.3275911, %v526_v33  ;;  %1533 = vpow2.f32 %v767_v43 }
  0xf9   : > { %v2014_v23 = vadd.f32 %v448_v17, %v1948_v55  ;;  %v477_v25 = vpop.f32.mrf.mxu1  ;;  %v695_v4 = vadd.f32 0.2548296, %v679_v47  ;;  %v557_v7 = vadd.f32 1.0, %v541_v40  ;;  %v749_v13 = vmul.f32 %v733_v45, %v525_v22  ;;  %v2046_v18 = vpop.eup %1529 }
  0xfa   : > { %v2017_v29 = vadd.f32 %v477_v25, %v1950_v58  ;;  %v649_v41 = vmul.f32 %v1983_v46, %v633_v26  ;;  %v750_v19 = vmul.f32 %v734_v50, %v526_v33  ;;  %v586_v61 = vmul.f32 1.0614054, %v2036_v53  ;;  %v2054_v40 = vpop.eup %1531 }
  0xfb   : > { %v2025_v34 = vmul.f32 0.70710677, %v2014_v23  ;;  %v711_v17 = vmul.f32 %v1973_v24, %v695_v4  ;;  %1535 = vpow2.f32 %v769_v54  ;;  %v558_v25 = vadd.f32 1.0, %v542_v59 }
  0xfc   : > { %v2028_v39 = vmul.f32 0.70710677, %v2017_v29  ;;  %v665_v52 = vadd.f32 -0.28449672, %v649_v41  ;;  %v616_v38 = vmul.f32 %v2001_v3, %v600_v42  ;;  %1537 = vrcp.f32 %v557_v7 }
  0xfd   : > { %v527_v35 = vand.u32 2147483647, %v2025_v34  ;;  %v771_v24 = vmul.f32 1.442695, %v749_v13  ;;  %v791_v41 = vmul.f32 %v1520_v27, %v711_v17  ;;  %v773_v43 = vmul.f32 1.442695, %v750_v19 }
  0xfe   : > { %v528_v51 = vand.u32 2147483647, %v2028_v39  ;;  %v681_v49 = vmul.f32 %v1983_v46, %v665_v52  ;;  %v2058_v45 = vmul.f32 0.5, %v2014_v23  ;;  %1539 = vrcp.f32 %v558_v25 }
  0xff   : > { %v735_v15 = vsub.f32 0.0, %v527_v35  ;;  %v543_v26 = vmul.f32 0.3275911, %v527_v35  ;;  %v807_v59 = vsub.f32 1.0, %v791_v41  ;;  %1541 = vpow2.f32 %v771_v24 }
 0x100   : > { %v450_v2 = vpop.f32.mrf.mxu0  ;;  %v736_v20 = vsub.f32 0.0, %v528_v51  ;;  %v544_v30 = vmul.f32 0.3275911, %v528_v51  ;;  %v697_v22 = vadd.f32 0.2548296, %v681_v49  ;;  %1543 = vpow2.f32 %v773_v43 }
 0x101   : > { %v451_v8 = vadd.f32 %v450_v2, %v1948_v55  ;;  %v479_v10 = vpop.f32.mrf.mxu1  ;;  %v751_v33 = vmul.f32 %v735_v15, %v527_v35  ;;  %v559_v52 = vadd.f32 1.0, %v543_v26  ;;  %v2063_v2 = vpop.eup %1533  ;;  %v839_v17 = vsub.f32 0.0, %v807_v59 }
 0x102   : > { %v480_v16 = vadd.f32 %v479_v10, %v1950_v58  ;;  %v752_v47 = vmul.f32 %v736_v20, %v528_v51  ;;  %v713_v50 = vmul.f32 %v1983_v46, %v697_v22  ;;  %v560_v4 = vadd.f32 1.0, %v544_v30  ;;  %v2069_v7 = vpop.eup %1535 }
 0x103   : > { %v2049_v28 = vmul.f32 0.70710677, %v451_v8  ;;  %v775_v46 = vmul.f32 1.442695, %v751_v33  ;;  %v2072_v10 = vmul.f32 0.5, %v2017_v29  ;;  %v2080_v19 = vpop.eup %1537  ;;  %1545 = vrcp.f32 %v559_v52 }
 0x104   : > { %v2051_v36 = vmul.f32 0.70710677, %v480_v16  ;;  %v793_v51 = vmul.f32 %v1526_v60, %v713_v50  ;;  %v777_v13 = vmul.f32 1.442695, %v752_v47  ;;  %1547 = vrcp.f32 %v560_v4  ;;  %v2086_v22 = vpop.eup %1539 }
 0x105   : > { %v529_v42 = vand.u32 2147483647, %v2049_v28  ;;  %2356 = vst [vmem:[#allocation16_spill] sm:$0xff] %v2072_v10  ;;  %1549 = vpow2.f32 %v775_v46  ;;  %v2088_v24 = vmul.f32 0.5, %v451_v8  ;;  %v2090_v33 = vmul.f32 0.5, %v480_v16 }
 0x106   : > { %v530_v27 = vand.u32 2147483647, %v2051_v36  ;;  %v809_v30 = vsub.f32 1.0, %v793_v51  ;;  %v855_v50 = vsel %vm823_vm0, %v807_v59, %v839_v17  ;;  %v602_v52 = vadd.f32 -1.4531521, %v586_v61 }
 0x107   : > { %v545_v60 = vmul.f32 0.3275911, %v529_v42  ;;  %v737_v20 = vsub.f32 0.0, %v529_v42  ;;  %2360 = vst [vmem:[#allocation20_spill] sm:$0xff] %v2090_v33  ;;  %1551 = vpow2.f32 %v777_v13  ;;  %vm829_vm5 = vcmp.ge.f32.partialorder %v2003_v5, 0.0 }
 0x108   : > { %v453_v54 = vpop.f32.mrf.mxu0  ;;  %v738_v29 = vsub.f32 0.0, %v530_v27  ;;  %v546_v43 = vmul.f32 0.3275911, %v530_v27  ;;  %v841_v47 = vsub.f32 0.0, %v809_v30  ;;  %vm830_vm7 = vcmp.ge.f32.partialorder %v2007_v9, 0.0 }
 0x109   : > { %v2067_v35 = vadd.f32 %v453_v54, %v1948_v55  ;;  %v482_v23 = vpop.f32.mrf.mxu1  ;;  %v2095_v54 = vpop.eup %1541  ;;  %v561_v4 = vadd.f32 1.0, %v545_v60  ;;  %vm833_vm8 = vcmp.ge.f32.partialorder %v2049_v28, 0.0  ;;  %vm831_vm9 = vcmp.ge.f32.partialorder %v2025_v34, 0.0 }
 0x10a   : > { %v2075_v49 = vadd.f32 %v482_v23, %v1950_v58  ;;  %v753_v23 = vmul.f32 %v737_v20, %v529_v42  ;;  %v2097_v46 = vpop.eup %1543  ;;  %v754_v8 = vmul.f32 %v738_v29, %v530_v27  ;;  %v857_v0 = vsel %vm825_vm1, %v809_v30, %v841_v47 }
 0x10b   : > { %2355 = vst [vmem:[#allocation15_spill] sm:$0xff] %v2067_v35  ;;  %v2078_v15 = vmul.f32 0.70710677, %v2067_v35  ;;  %v2104_v59 = vpop.eup %1545  ;;  %v871_v42 = vadd.f32 1.0, %v855_v50  ;;  %v873_v17 = vadd.f32 1.0, %v857_v0  ;;  %v562_v60 = vadd.f32 1.0, %v546_v43 }
 0x10c   : > { %2357 = vst [vmem:[#allocation17_spill] sm:$0xff] %v2075_v49  ;;  %v2083_v25 = vmul.f32 0.70710677, %v2075_v49  ;;  %v632_v49 = vadd.f32 1.4214138, %v616_v38  ;;  %v2109_v38 = vpop.eup %1547  ;;  %1553 = vrcp.f32 %v561_v4  ;;  %vm832_vm10 = vcmp.ge.f32.partialorder %v2028_v39, 0.0 }
 0x10d   : > { %2358 = vst [vmem:[#allocation18_spill] sm:$0xff] %v2078_v15  ;;  %v531_v26 = vand.u32 2147483647, %v2078_v15  ;;  %v2115_v29 = vpop.eup %1549  ;;  %v2121_v47 = vmul.f32 1.442695, %v754_v8  ;;  %v887_v4 = vmul.f32 %v871_v42, %v1990_v56  ;;  %1555 = vrcp.f32 %v562_v60 }
 0x10e   : > { %2359 = vst [vmem:[#allocation19_spill] sm:$0xff] %v2083_v25  ;;  %v532_v41 = vand.u32 2147483647, %v2083_v25  ;;  %v589_v60 = vmul.f32 1.0614054, %v2080_v19  ;;  %vm834_vm11 = vcmp.ge.f32.partialorder %v2051_v36, 0.0 }
 0x10f   : > { %v739_v16 = vsub.f32 0.0, %v531_v26  ;;  %v547_v27 = vmul.f32 0.3275911, %v531_v26  ;;  %v592_v21 = vmul.f32 1.0614054, %v2109_v38  ;;  %v2368_v36 = vld [vmem:[#allocation20_spill] sm:$0xff] }
 0x110   : > { %v455_v51 = vpop.f32.mrf.mxu0  ;;  %v740_v61 = vsub.f32 0.0, %v532_v41  ;;  %v548_v14 = vmul.f32 0.3275911, %v532_v41 }
 0x111   : > { %v2100_v35 = vadd.f32 %v455_v51, %v1948_v55  ;;  %v484_v25 = vpop.f32.mrf.mxu1  ;;  %v618_v55 = vmul.f32 %v2036_v53, %v602_v52  ;;  %v755_v50 = vmul.f32 %v739_v16, %v531_v26  ;;  %v2126_v51 = vpop.eup %1551 }
 0x112   : > { %v2107_v13 = vadd.f32 %v484_v25, %v1950_v58  ;;  %v648_v58 = vmul.f32 %v2001_v3, %v632_v49  ;;  %v779_v25 = vmul.f32 1.442695, %v753_v23  ;;  %v756_v0 = vmul.f32 %v740_v61, %v532_v41  ;;  %v2139_v56 = vpop.eup %1553 }
 0x113   : > { %2361 = vst [vmem:[#allocation21_spill] sm:$0xff] %v2100_v35  ;;  %v2112_v20 = vmul.f32 0.70710677, %v2100_v35  ;;  %v563_v35 = vadd.f32 1.0, %v547_v27  ;;  %v634_v23 = vadd.f32 1.4214138, %v618_v55 }
 0x114   : > { %2362 = vst [vmem:[#allocation22_spill] sm:$0xff] %v2107_v13  ;;  %v2118_v30 = vmul.f32 0.70710677, %v2107_v13  ;;  %v889_v13 = vmul.f32 %v873_v17, %v1996_v62  ;;  %v564_v8 = vadd.f32 1.0, %v548_v14  ;;  %1557 = vpow2.f32 %v779_v25 }
 0x115   : > { %2363 = vst [vmem:[#allocation23_spill] sm:$0xff] %v2112_v20  ;;  %v2124_v43 = vand.u32 2147483647, %v2112_v20  ;;  %v664_v20 = vadd.f32 -0.28449672, %v648_v58  ;;  %v650_v41 = vmul.f32 %v2036_v53, %v634_v23  ;;  %1559 = vrcp.f32 %v563_v35 }
 0x116   : > { %2364 = vst [vmem:[#allocation24_spill] sm:$0xff] %v2118_v30  ;;  %v2129_v52 = vand.u32 2147483647, %v2118_v30  ;;  %v903_v16 = vpack.c.bf16 %v889_v13, %v887_v4  ;;  %v2135_v15 = vmul.f32 1.442695, %v755_v50  ;;  %1561 = vrcp.f32 %v564_v8  ;;  %v2146_v50 = vpop.eup %1555 }
 0x117   : > { %v549_v49 = vmul.f32 0.3275911, %v2124_v43  ;;  %v587_v61 = vmul.f32 1.0614054, %v2046_v18  ;;  %v2141_v62 = vmul.f32 1.442695, %v756_v0  ;;  %v680_v17 = vmul.f32 %v2001_v3, %v664_v20 }
 0x118   : > { %v550_v26 = vmul.f32 0.3275911, %v2129_v52  ;;  %1051 = vmatmul.bf16.vlgmr.msra.gmra.mxu2 %v903_v16  ;;  %v666_v27 = vadd.f32 -0.28449672, %v650_v41  ;;  %v605_v25 = vadd.f32 -1.4531521, %v589_v60 }
 0x119   : > { %v565_v42 = vadd.f32 1.0, %v549_v49  ;;  %v603_v55 = vadd.f32 -1.4531521, %v587_v61  ;;  %v696_v58 = vadd.f32 0.2548296, %v680_v17 }
 0x11a   : > { %v566_v13 = vadd.f32 1.0, %v550_v26  ;;  %v682_v4 = vmul.f32 %v2036_v53, %v666_v27  ;;  %v588_v35 = vmul.f32 1.0614054, %v2054_v40  ;;  %v621_v23 = vmul.f32 %v2080_v19, %v605_v25  ;;  %v2156_v26 = vpop.eup %1557 }
 0x11b   : > { %v619_v20 = vmul.f32 %v2046_v18, %v603_v55  ;;  %1563 = vrcp.f32 %v565_v42  ;;  %v712_v49 = vmul.f32 %v2001_v3, %v696_v58  ;;  %v590_v8 = vmul.f32 1.0614054, %v2086_v22  ;;  %v2161_v55 = vpop.eup %1559 }
 0x11c   : > { %1565 = vrcp.f32 %v566_v13  ;;  %v698_v16 = vadd.f32 0.2548296, %v682_v4  ;;  %v604_v61 = vadd.f32 -1.4531521, %v588_v35  ;;  %v637_v60 = vadd.f32 1.4214138, %v621_v23  ;;  %v2167_v4 = vpop.eup %1561 }
 0x11d   : > { %v635_v41 = vadd.f32 1.4214138, %v619_v20  ;;  %v792_v17 = vmul.f32 %v2019_v31, %v712_v49  ;;  %v606_v27 = vadd.f32 -1.4531521, %v590_v8  ;;  %v591_v42 = vmul.f32 1.0614054, %v2104_v59 }
 0x11e   : > { %v714_v3 = vmul.f32 %v2036_v53, %v698_v16  ;;  %v620_v25 = vmul.f32 %v2054_v40, %v604_v61  ;;  %v593_v13 = vmul.f32 1.0614054, %v2139_v56  ;;  %v653_v35 = vmul.f32 %v2080_v19, %v637_v60 }
 0x11f   : > { %v651_v58 = vmul.f32 %v2046_v18, %v635_v41  ;;  %v808_v20 = vsub.f32 1.0, %v792_v17  ;;  %v622_v31 = vmul.f32 %v2086_v22, %v606_v27  ;;  %v607_v49 = vadd.f32 -1.4531521, %v591_v42 }
 0x120   : > { %v794_v23 = vmul.f32 %v2042_v11, %v714_v3  ;;  %v636_v0 = vadd.f32 1.4214138, %v620_v25  ;;  %v609_v14 = vadd.f32 -1.4531521, %v593_v13  ;;  %v669_v41 = vadd.f32 -0.28449672, %v653_v35 }
 0x121   : > { %v667_v8 = vadd.f32 -0.28449672, %v651_v58  ;;  %v2172_v53 = vpop.eup %1563  ;;  %v840_v16 = vsub.f32 0.0, %v808_v20  ;;  %v638_v61 = vadd.f32 1.4214138, %v622_v31  ;;  %v623_v30 = vmul.f32 %v2104_v59, %v607_v49 }
 0x122   : > { %v2175_v33 = vpop.eup %1565  ;;  %v810_v17 = vsub.f32 1.0, %v794_v23  ;;  %v652_v27 = vmul.f32 %v2054_v40, %v636_v0  ;;  %v625_v42 = vmul.f32 %v2139_v56, %v609_v14  ;;  %v685_v3 = vmul.f32 %v2080_v19, %v669_v41 }
 0x123   : > { %v683_v60 = vmul.f32 %v2046_v18, %v667_v8  ;;  %v856_v11 = vsel %vm824_vm2, %v808_v20, %v840_v16  ;;  %v654_v58 = vmul.f32 %v2086_v22, %v638_v61  ;;  %v639_v25 = vadd.f32 1.4214138, %v623_v30 }
 0x124   : > { %v842_v13 = vsub.f32 0.0, %v810_v17  ;;  %v872_v35 = vadd.f32 1.0, %v856_v11  ;;  %v668_v49 = vadd.f32 -0.28449672, %v652_v27  ;;  %v701_v23 = vadd.f32 0.2548296, %v685_v3 }
 0x125   : > { %v699_v31 = vadd.f32 0.2548296, %v683_v60  ;;  %v670_v8 = vadd.f32 -0.28449672, %v654_v58  ;;  %v641_v10 = vadd.f32 1.4214138, %v625_v42  ;;  %v655_v0 = vmul.f32 %v2104_v59, %v639_v25 }
 0x126   : > { %v858_v6 = vsel %vm826_vm3, %v810_v17, %v842_v13  ;;  %v888_v14 = vmul.f32 %v872_v35, %v1993_v57  ;;  %v684_v20 = vmul.f32 %v2054_v40, %v668_v49  ;;  %v717_v41 = vmul.f32 %v2080_v19, %v701_v23 }
 0x127   : > { %v715_v30 = vmul.f32 %v2046_v18, %v699_v31  ;;  %v874_v16 = vadd.f32 1.0, %v858_v6  ;;  %v686_v61 = vmul.f32 %v2086_v22, %v670_v8  ;;  %v657_v60 = vmul.f32 %v2139_v56, %v641_v10 }
 0x128   : > { %v700_v42 = vadd.f32 0.2548296, %v684_v20  ;;  %v671_v11 = vadd.f32 -0.28449672, %v655_v0  ;;  %v797_v18 = vmul.f32 %v2095_v54, %v717_v41  ;;  %v608_v23 = vadd.f32 -1.4531521, %v592_v21 }
 0x129   : > { %v795_v27 = vmul.f32 %v2063_v2, %v715_v30  ;;  %v890_v57 = vmul.f32 %v874_v16, %v1998_v63  ;;  %v702_v17 = vadd.f32 0.2548296, %v686_v61  ;;  %v673_v3 = vadd.f32 -0.28449672, %v657_v60 }
 0x12a   : > { %v716_v58 = vmul.f32 %v2054_v40, %v700_v42  ;;  %v687_v10 = vmul.f32 %v2104_v59, %v671_v11  ;;  %v594_v2 = vmul.f32 1.0614054, %v2146_v50  ;;  %v813_v13 = vsub.f32 1.0, %v797_v18 }
 0x12b   : > { %v811_v19 = vsub.f32 1.0, %v795_v27  ;;  %v904_v25 = vpack.c.bf16 %v890_v57, %v888_v14  ;;  %v718_v35 = vmul.f32 %v2086_v22, %v702_v17  ;;  %v689_v31 = vmul.f32 %v2139_v56, %v673_v3 }
 0x12c   : > { %v796_v54 = vmul.f32 %v2069_v7, %v716_v58  ;;  %v703_v49 = vadd.f32 0.2548296, %v687_v10  ;;  %v845_v8 = vsub.f32 0.0, %v813_v13  ;;  %v610_v6 = vadd.f32 -1.4531521, %v594_v2 }
 0x12d   : > { %v843_v63 = vsub.f32 0.0, %v811_v19  ;;  %1080 = vmatmul.bf16.vlgmr.msra.gmra.mxu3 %v904_v25  ;;  %v798_v0 = vmul.f32 %v2097_v46, %v718_v35  ;;  %v705_v40 = vadd.f32 0.2548296, %v689_v31  ;;  %v624_v20 = vmul.f32 %v2109_v38, %v608_v23 }
 0x12e   : > { %v812_v30 = vsub.f32 1.0, %v796_v54  ;;  %v719_v22 = vmul.f32 %v2104_v59, %v703_v49  ;;  %v861_v7 = vsel %vm829_vm5, %v813_v13, %v845_v8  ;;  %v626_v37 = vmul.f32 %v2146_v50, %v610_v6 }
 0x12f   : > { %v859_v14 = vsel %vm827_vm4, %v811_v19, %v843_v63  ;;  %v814_v41 = vsub.f32 1.0, %v798_v0  ;;  %v721_v46 = vmul.f32 %v2139_v56, %v705_v40  ;;  %v877_v61 = vadd.f32 1.0, %v861_v7 }
 0x130   : > { %v875_v16 = vadd.f32 1.0, %v859_v14  ;;  %v844_v60 = vsub.f32 0.0, %v812_v30  ;;  %v799_v27 = vmul.f32 %v2115_v29, %v719_v22  ;;  %v640_v21 = vadd.f32 1.4214138, %v624_v20 }
 0x131   : > { %v846_v59 = vsub.f32 0.0, %v814_v41  ;;  %v801_v11 = vmul.f32 %v2156_v26, %v721_v46  ;;  %v893_v57 = vmul.f32 %v877_v61, %v2033_v48  ;;  %v642_v17 = vadd.f32 1.4214138, %v626_v37 }
 0x132   : > { %v891_v42 = vmul.f32 %v875_v16, %v2005_v12  ;;  %v860_v5 = vsel %vm828_vm6, %v812_v30, %v844_v60  ;;  %v815_v18 = vsub.f32 1.0, %v799_v27  ;;  %v656_v19 = vmul.f32 %v2109_v38, %v640_v21 }
 0x133   : > { %v862_v56 = vsel %vm830_vm7, %v814_v41, %v846_v59  ;;  %v876_v3 = vadd.f32 1.0, %v860_v5  ;;  %v817_v29 = vsub.f32 1.0, %v801_v11  ;;  %v658_v26 = vmul.f32 %v2146_v50, %v642_v17 }
 0x134   : > { %v905_v58 = vpack.c.bf16 %v893_v57, %v891_v42  ;;  %v878_v12 = vadd.f32 1.0, %v862_v56  ;;  %v847_v10 = vsub.f32 0.0, %v815_v18  ;;  %1567 = vpow2.f32 %v2121_v47 }
 0x135   : > { %v849_v48 = vsub.f32 0.0, %v817_v29  ;;  %v672_v2 = vadd.f32 -0.28449672, %v656_v19  ;;  %v595_v44 = vmul.f32 1.0614054, %v2161_v55  ;;  %v2365_v25 = vsub.f32 0.0, %v2124_v43 }
 0x136   : > { %1056 = vmatmul.bf16.gmra.mxu2 %v905_v58  ;;  %v894_v13 = vmul.f32 %v878_v12, %v2038_v1  ;;  %v674_v35 = vadd.f32 -0.28449672, %v658_v26  ;;  %v597_v31 = vmul.f32 1.0614054, %v2172_v53  ;;  %v892_v63 = vmul.f32 %v876_v3, %v2021_v32 }
 0x137   : > { %v757_v9 = vmul.f32 %v2365_v25, %v2124_v43  ;;  %v865_v54 = vsel %vm833_vm8, %v817_v29, %v849_v48  ;;  %v688_v47 = vmul.f32 %v2109_v38, %v672_v2  ;;  %v611_v49 = vadd.f32 -1.4531521, %v595_v44 }
 0x138   : > { %v2366_v23 = vsub.f32 0.0, %v2129_v52  ;;  %v863_v43 = vsel %vm831_vm9, %v815_v18, %v847_v10  ;;  %v690_v1 = vmul.f32 %v2146_v50, %v674_v35  ;;  %v613_v0 = vadd.f32 -1.4531521, %v597_v31 }
 0x139   : > { %v906_v40 = vpack.c.bf16 %v894_v13, %v892_v63  ;;  %v704_v6 = vadd.f32 0.2548296, %v688_v47  ;;  %v627_v32 = vmul.f32 %v2161_v55, %v611_v49  ;;  %v596_v28 = vmul.f32 1.0614054, %v2167_v4  ;;  %v2367_v49 = vld [vmem:[#allocation16_spill] sm:$0xff] }
 0x13a   : > { %v758_v8 = vmul.f32 %v2366_v23, %v2129_v52  ;;  %v881_v14 = vadd.f32 1.0, %v865_v54  ;;  %v706_v30 = vadd.f32 0.2548296, %v690_v1  ;;  %v629_v22 = vmul.f32 %v2172_v53, %v613_v0  ;;  %v1568_v20 = vpop.eup %1567 }
 0x13b   : > { %v598_v52 = vmul.f32 1.0614054, %v2175_v33  ;;  %v787_v34 = vmul.f32 1.442695, %v757_v9  ;;  %v720_v7 = vmul.f32 %v2109_v38, %v704_v6  ;;  %v643_v16 = vadd.f32 1.4214138, %v627_v32 }
 0x13c   : > { %v612_v41 = vadd.f32 -1.4531521, %v596_v28  ;;  %v879_v46 = vadd.f32 1.0, %v863_v43  ;;  %v722_v61 = vmul.f32 %v2146_v50, %v706_v30  ;;  %v645_v60 = vadd.f32 1.4214138, %v629_v22 }
 0x13d   : > { %v614_v27 = vadd.f32 -1.4531521, %v598_v52  ;;  %v789_v37 = vmul.f32 1.442695, %v758_v8  ;;  %1085 = vmatmul.bf16.gmra.mxu3 %v906_v40  ;;  %v800_v42 = vmul.f32 %v2126_v51, %v720_v7  ;;  %v659_v59 = vmul.f32 %v2161_v55, %v643_v16  ;;  %v2370_v16 = vld [vmem:[#allocation23_spill] sm:$0xff] }
 0x13e   : > { %v628_v11 = vmul.f32 %v2167_v4, %v612_v41  ;;  %v897_v21 = vmul.f32 %v881_v14, %v2088_v24  ;;  %v802_v57 = vmul.f32 %v1568_v20, %v722_v61  ;;  %v661_v38 = vmul.f32 %v2172_v53, %v645_v60  ;;  %v2369_v20 = vld [vmem:[#allocation18_spill] sm:$0xff] }
 0x13f   : > { %v630_v5 = vmul.f32 %v2175_v33, %v614_v27  ;;  %1569 = vpow2.f32 %v2135_v15  ;;  %v816_v50 = vsub.f32 1.0, %v800_v42  ;;  %v675_v18 = vadd.f32 -0.28449672, %v659_v59  ;;  %v2372_v42 = vld [vmem:[#allocation21_spill] sm:$0xff] }
 0x140   : > { %v644_v17 = vadd.f32 1.4214138, %v628_v11  ;;  %v895_v56 = vmul.f32 %v879_v46, %v2058_v45  ;;  %v818_v3 = vsub.f32 1.0, %v802_v57  ;;  %v677_v51 = vadd.f32 -0.28449672, %v661_v38  ;;  %v2374_v38 = vld [vmem:[#allocation24_spill] sm:$0xff] }
 0x141   : > { %v646_v29 = vadd.f32 1.4214138, %v630_v5  ;;  %1571 = vpow2.f32 %v787_v34  ;;  %v848_v19 = vsub.f32 0.0, %v816_v50  ;;  %v691_v58 = vmul.f32 %v2161_v55, %v675_v18 }
 0x142   : > { %v660_v24 = vmul.f32 %v2167_v4, %v644_v17  ;;  %v907_v12 = vpack.c.bf16 %v897_v21, %v895_v56  ;;  %v850_v10 = vsub.f32 0.0, %v818_v3  ;;  %v693_v26 = vmul.f32 %v2172_v53, %v677_v51  ;;  %v2373_v21 = vld [vmem:[#allocation19_spill] sm:$0xff]  ;;  %v2375_v56 = vld [vmem:[#allocation22_spill] sm:$0xff] }
 0x143   : > { %v662_v15 = vmul.f32 %v2175_v33, %v646_v29  ;;  %1573 = vpow2.f32 %v2141_v62  ;;  %v864_v45 = vsel %vm832_vm10, %v816_v50, %v848_v19  ;;  %v707_v48 = vadd.f32 0.2548296, %v691_v58  ;;  %v2376_v58 = vld [vmem:[#allocation17_spill] sm:$0xff] }
 0x144   : > { %v676_v2 = vadd.f32 -0.28449672, %v660_v24  ;;  %v866_v44 = vsel %vm834_vm11, %v818_v3, %v850_v10  ;;  %v880_v25 = vadd.f32 1.0, %v864_v45  ;;  %v709_v9 = vadd.f32 0.2548296, %v693_v26 }
 0x145   : > { %v678_v13 = vadd.f32 -0.28449672, %v662_v15  ;;  %v1570_v35 = vpop.eup %1569  ;;  %1575 = vpow2.f32 %v789_v37  ;;  %v882_v31 = vadd.f32 1.0, %v866_v44  ;;  %v723_v63 = vmul.f32 %v2161_v55, %v707_v48  ;;  %v2371_v37 = vld [vmem:[#allocation15_spill] sm:$0xff]  ;;  %v1512_v45 = vld [vmem:[%s2337_s4] ss:$0 sm:$0xff] }
 0x146   : > { %v692_v54 = vmul.f32 %v2167_v4, %v676_v2  ;;  %1061 = vmatmul.bf16.gmra.mxu2 %v907_v12  ;;  %v725_v62 = vmul.f32 %v2172_v53, %v709_v9  ;;  %v896_v23 = vmul.f32 %v880_v25, %v2367_v49  ;;  %vm835_vm12 = vcmp.ge.f32.partialorder %v2369_v20, 0.0 }
 0x147   : > { %v694_v39 = vmul.f32 %v2175_v33, %v678_v13  ;;  %v1572_v47 = vpop.eup %1571  ;;  %v898_v8 = vmul.f32 %v882_v31, %v2368_v36  ;;  %v803_v43 = vmul.f32 %v1570_v35, %v723_v63  ;;  %vm837_vm13 = vcmp.ge.f32.partialorder %v2370_v16, 0.0 }
 0x148   : > { %v708_v1 = vadd.f32 0.2548296, %v692_v54  ;;  %v805_v0 = vmul.f32 %v1572_v47, %v725_v62  ;;  %v501_v59 = vmul.f32 0.5, %v2372_v42  ;;  %vm836_vm14 = vcmp.ge.f32.partialorder %v2373_v21, 0.0 }
 0x149   : > { %v710_v40 = vadd.f32 0.2548296, %v694_v39  ;;  %v1574_v6 = vpop.eup %1573  ;;  %v908_v32 = vpack.c.bf16 %v898_v8, %v896_v23  ;;  %v819_v28 = vsub.f32 1.0, %v803_v43  ;;  %vm838_vm15 = vcmp.ge.f32.partialorder %v2374_v38, 0.0 }
 0x14a   : > { %v724_v55 = vmul.f32 %v2167_v4, %v708_v1  ;;  %v821_v14 = vsub.f32 1.0, %v805_v0  ;;  %v499_v4 = vmul.f32 0.5, %v2371_v37  ;;  %v502_v3 = vmul.f32 0.5, %v2375_v56 }
 0x14b   : > { %v726_v30 = vmul.f32 %v2175_v33, %v710_v40  ;;  %v1576_v53 = vpop.eup %1575  ;;  %v851_v22 = vsub.f32 0.0, %v819_v28  ;;  %v500_v24 = vmul.f32 0.5, %v2376_v58 }
 0x14c   : > { %v804_v52 = vmul.f32 %v1574_v6, %v724_v55  ;;  %v853_v34 = vsub.f32 0.0, %v821_v14 }
 0x14d   : > { %v806_v7 = vmul.f32 %v1576_v53, %v726_v30  ;;  %1090 = vmatmul.bf16.gmra.mxu3 %v908_v32  ;;  %v867_v41 = vsel %vm835_vm12, %v819_v28, %v851_v22 }
 0x14e   : > { %v820_v46 = vsub.f32 1.0, %v804_v52  ;;  %v869_v61 = vsel %vm837_vm13, %v821_v14, %v853_v34  ;;  %v883_v60 = vadd.f32 1.0, %v867_v41 }
 0x14f   : > { %v822_v27 = vsub.f32 1.0, %v806_v7  ;;  %v885_v33 = vadd.f32 1.0, %v869_v61 }
 0x150   : > { %v852_v11 = vsub.f32 0.0, %v820_v46  ;;  %v899_v5 = vmul.f32 %v883_v60, %v499_v4 }
 0x151   : > { %v854_v57 = vsub.f32 0.0, %v822_v27  ;;  %v901_v50 = vmul.f32 %v885_v33, %v501_v59 }
 0x152   : > { %v868_v18 = vsel %vm836_vm14, %v820_v46, %v852_v11 }
 0x153   : > { %v870_v17 = vsel %vm838_vm15, %v822_v27, %v854_v57  ;;  %v909_v51 = vpack.c.bf16 %v901_v50, %v899_v5  ;;  %v884_v29 = vadd.f32 1.0, %v868_v18 }
 0x154   : > { %v886_v19 = vadd.f32 1.0, %v870_v17 }
 0x155   : > { %v900_v10 = vmul.f32 %v884_v29, %v500_v24 }
 0x156   : > { %v902_v12 = vmul.f32 %v886_v19, %v502_v3  ;;  %1066 = vmatmul.bf16.gmra.mxu2 %v909_v51 }
 0x158   : > { %v910_v26 = vpack.c.bf16 %v902_v12, %v900_v10 }
 0x15d   : > { %1095 = vmatmul.bf16.gmra.mxu3 %v910_v26 }
 0x19b   : > { %v1052_v15 = vpop.f32.mrf.mxu2 }
 0x19c   : > { %v1053_v48 = vadd.f32 %v1512_v45, %v1052_v15 }
 0x1a3   : > { %v1054_v2 = vpop.f32.mrf.mxu2 }
 0x1a4   : > { %v1055_v9 = vadd.f32 %v1512_v45, %v1054_v2 }
 0x1b0   : > { %v1081_v44 = vpop.f32.mrf.mxu3 }
 0x1b1   : > { %v1082_v25 = vadd.f32 %v1081_v44, %v1053_v48 }
 0x1b3   : > { %1101 = vst [vmem:[%s2290_s16] sm:$0xff] %v1082_v25 }
 0x1b8   : > { %v1083_v13 = vpop.f32.mrf.mxu3 }
 0x1b9   : > { %v1084_v35 = vadd.f32 %v1083_v13, %v1055_v9  ;;  %v1057_v31 = vpop.f32.mrf.mxu2 }
 0x1ba   : > { %v1058_v63 = vadd.f32 %v1512_v45, %v1057_v31 }
 0x1bb   : > { %1102 = vst [vmem:[%s2290_s16 + $0x8] sm:$0xff] %v1084_v35 }
 0x1c0   : > { %v1086_v54 = vpop.f32.mrf.mxu3 }
 0x1c1   : > { %v1087_v62 = vadd.f32 %v1086_v54, %v1058_v63  ;;  %v1059_v39 = vpop.f32.mrf.mxu2 }
 0x1c2   : > { %v1060_v47 = vadd.f32 %v1512_v45, %v1059_v39 }
 0x1c3   : > { %1103 = vst [vmem:[%s2290_s16 + $0x10] sm:$0xff] %v1087_v62 }
 0x1c8   : > { %v1088_v49 = vpop.f32.mrf.mxu3 }
 0x1c9   : > { %v1089_v23 = vadd.f32 %v1088_v49, %v1060_v47  ;;  %v1062_v36 = vpop.f32.mrf.mxu2 }
 0x1ca   : > { %v1063_v8 = vadd.f32 %v1512_v45, %v1062_v36 }
 0x1cb   : > { %1104 = vst [vmem:[%s2290_s16 + $0x18] sm:$0xff] %v1089_v23 }
 0x1d0   : > { %v1091_v43 = vpop.f32.mrf.mxu3 }
 0x1d1   : > { %v1092_v1 = vadd.f32 %v1091_v43, %v1063_v8  ;;  %v1064_v0 = vpop.f32.mrf.mxu2 }
 0x1d2   : > { %v1065_v40 = vadd.f32 %v1512_v45, %v1064_v0 }
 0x1d3   : > { %1105 = vst [vmem:[%s2290_s16 + $0x20] sm:$0xff] %v1092_v1 }
 0x1d8   : > { %v1093_v6 = vpop.f32.mrf.mxu3 }
 0x1d9   : > { %v1094_v32 = vadd.f32 %v1093_v6, %v1065_v40  ;;  %v1067_v28 = vpop.f32.mrf.mxu2 }
 0x1da   : > { %v1068_v55 = vadd.f32 %v1512_v45, %v1067_v28 }
 0x1db   : > { %1106 = vst [vmem:[%s2290_s16 + $0x28] sm:$0xff] %v1094_v32 }
 0x1e0   : > { %v1096_v14 = vpop.f32.mrf.mxu3 }
 0x1e1   : > { %v1097_v30 = vadd.f32 %v1096_v14, %v1068_v55  ;;  %v1069_v53 = vpop.f32.mrf.mxu2 }
 0x1e2   : > { %v1070_v22 = vadd.f32 %v1512_v45, %v1069_v53 }
 0x1e3   : > { %1107 = vst [vmem:[%s2290_s16 + $0x30] sm:$0xff] %v1097_v30 }
 0x1e8   : > { %v1098_v52 = vpop.f32.mrf.mxu3 }
 0x1e9   : > { %v1099_v20 = vadd.f32 %v1098_v52, %v1070_v22 }
 0x1eb   : > { %1108 = vst [vmem:[%s2290_s16 + $0x38] sm:$0xff] %v1099_v20 }
 0x1ec   : > { %1724 = shalt.err (!%p1721_p10)
}
 0x1ed   : > { %s1780_s17 = smov 128   ;;  %s1781_s28 = smov 8  }
 0x1ee   : > { %1443 = dma.vmem_to_hbm [thread:$0]  (%p1896_p0), %s1123_s12, 1024, %s1125_s14, %s1110_s15, %s1780_s17, %s1780_s17, %s1781_s28  }
 0x1ef PF: > { %p1470_p11 = scmp.ge.s32.totalorder %s1771_s21, 2  ;;  %s1139_s16 = sand.u32 1, %s1759_s18  }
 0x1f0   : > { %s1140_s23 = scalar_lea.sflag [#allocation4], %s1139_s16 }
 0x1f1   : > { %p1460_p12 = pnand %p1470_p11, %p1847_p6 }
 0x1f3   : > { %p1461_p13 = pneg %p1460_p12 }
 0x1f5   : > { %1754 = dma.done.wait (%p1461_p13), %s1140_s23, 1024  }
 0x1f6   : > { %1756 = vsyncadd (%p1461_p13), %s1140_s23, 4294966272  ;;  %p20_p3 = scmp.ge.s32.totalorder %s1883_s30, 6   ;;  %s2377_s18 = smov %s1763_s19 }
 0x1f7   : > { %s2378_s19 = smov %s1767_s20  ;;  %s2379_s20 = smov %s1892_s9 }
 0x1f8   : > { %s2380_s21 = smov %s1883_s30  ;;  %22 = sbr.rel (!%p20_p3) target bundleno = 7 (0x7), region = 97 }
 0x1fd   :  { %1146 = vsyncpa [#allocation3], 1 }
 0x1fe   :  { %1148 = vsyncpa [#allocation3 + $0x1], 1 }
 0x1ff   :  { %1149 = vsyncpa [#allocation6], 1 }
 0x200   :  { %1150 = vsyncpa [#allocation9], 1 }
 0x201   :  { %1151 = vsyncpa [#allocation4], 1 }
 0x202   :  { %1153 = vsyncpa [#allocation4 + $0x1], 1 }

// kernel: tpu_custom_call.1
= control target key start
LH: loop header
LB: loop body
LE: loop exit
PB: predicated region body
PF: predicated region fallthrough
CT: control target
= control target key end

     0   :  { %10 = vsyncpa [#allocation3], 0  ;;  %s2333_s0 = inlined_call_operand.hbm [shape: bf16[256,128], index: 0, kind: input, shape index: {}]   ;;  %s2334_s1 = inlined_call_operand.hbm [shape: bf16[128,256], index: 1, kind: input, shape index: {}]   ;;  %s2335_s2 = inlined_call_operand.hbm [shape: f32[1,256], index: 2, kind: input, shape index: {}]   ;;  %s2336_s3 = inlined_call_operand.hbm [shape: bf16[256,128], index: 3, kind: input, shape index: {}]   ;;  %s2337_s4 = inlined_call_operand.vmem [shape: f32[1,128], index: 4, kind: input, shape index: {}]   ;;  %s2338_s5 = inlined_call_operand.hbm [shape: f32[256,128], index: 5, kind: output, shape index: {}]  }
   0x1   :  { %12 = vsyncpa [#allocation3 + $0x1], 0 }
   0x2   :  { %13 = vsyncpa [#allocation6], 0 }
   0x3   :  { %14 = vsyncpa [#allocation9], 0 }
   0x4   :  { %15 = vsyncpa [#allocation4], 0 }
   0x5   :  { %17 = vsyncpa [#allocation4 + $0x1], 0  ;;  %s1812_s18 = smov 0   ;;  %s1814_s19 = smov 0  }
   0x6   :  { %s1816_s20 = smov 0   ;;  %s1818_s21 = smov 0  }
   0x7 LB: > { %s1833_s22 = sadd.s32 4294967295, %s1771_s21   ;;  %s1227_s23 = sadd.s32 4294967294, %s1771_s21   ;;  %s1771_s21 = sphi %s1818_s21, %s2380_s21   ;;  %s1767_s20 = sphi %s1816_s20, %s2379_s20   ;;  %s1763_s19 = sphi %s1814_s19, %s2378_s19   ;;  %s1759_s18 = sphi %s1812_s18, %s2377_s18  }
   0x8   : > { %p43_p0 = scmp.ne.s32.totalorder %s1763_s19, %s1759_s18  ;;  %p44_p1 = scmp.eq.s32.totalorder %s1833_s22, 0 }
   0x9   : > { %p151_p2 = scmp.eq.s32.totalorder %s1833_s22, 3  ;;  %p157_p3 = scmp.eq.s32.totalorder %s1227_s23, 3 }
   0xa   : > { %p1842_p4 = por %p44_p1, %p43_p0  ;;  %p1228_p5 = scmp.ge.s32.totalorder %s1771_s21, 1 }
   0xb   : > { %p1847_p6 = por %p157_p3, %p43_p0  ;;  %p164_p7 = scmp.lt.s32.totalorder %s1771_s21, 5 }
   0xc   : > { %s175_s28 = sshll.u32 %s2334_s1, 4  ;;  %s1773_s30 = smov [#allocation5]   ;;  %s176_s28 = int_to_ptr.hbm [resolvable:$true] %s175_s28 }
   0xd   : > { %p1855_p8 = pnand %p1228_p5, %p164_p7  ;;  %s177_s6 = sshll.u32 %s1773_s30, 4  ;;  %s178_s6 = int_to_ptr.vmem [resolvable:$true] %s177_s6 }
   0xe   : > { %s190_s10 = sshll.u32 %s2335_s2, 4  ;;  %s1774_s11 = smov 128   ;;  %s191_s10 = int_to_ptr.hbm [resolvable:$true] %s190_s10 }
   0xf   : > { %p1445_p9 = pneg %p1855_p8  ;;  %s1775_s12 = smov 8  }
  0x10   : > { %s1776_s13 = smov [#allocation7]   ;;  %s201_s17 = sshll.u32 %s2336_s3, 4  ;;  %s202_s17 = int_to_ptr.hbm [resolvable:$true] %s201_s17 }
  0x11   : > { %p1863_p10 = pnand %p1445_p9, %p44_p1  ;;  %s192_s14 = sshll.u32 %s1776_s13, 4  ;;  %s193_s14 = int_to_ptr.vmem [resolvable:$true] %s192_s14 }
  0x12   : > { %s1777_s23 = smov [#allocation8]   ;;  %s2339_s27 = smov 64  }
  0x13   : > { %1448 = dma.hbm_to_vmem [thread:$0]  (!%p1863_p10), %s176_s28, 2048, %s178_s6, [#allocation6], %s1774_s11, %s1774_s11, %s1775_s12  }
  0x14   : > { %1451 = dma.hbm_to_vmem [thread:$0]  (!%p1863_p10), %s191_s10, 32, %s193_s14, [#allocation6]  }
  0x15   : > { %s203_s26 = sshll.u32 %s1777_s23, 4  ;;  %s1779_s28 = smov 4   ;;  %s204_s26 = int_to_ptr.vmem [resolvable:$true] %s203_s26 }
  0x16   : > { %1454 = dma.hbm_to_vmem [thread:$0]  (!%p1863_p10), %s202_s17, 2048, %s204_s26, [#allocation9], %s2339_s27, %s2339_s27, %s1779_s28  }
  0x17   : > { %s1883_s30 = sadd.s32 1, %s1771_s21   ;;  %s30_s8 = sadd.s32 1, %s1767_s20 }
  0x18   : > { %s27_s6 = ssub.s32 %s1771_s21, %s1883_s30  ;;  %p37_p12 = scmp.ne.s32.totalorder %s1767_s20, %s1763_s19 }
  0x19   : > { %p28_p11 = scmp.eq.s32.totalorder %s27_s6, 0  ;;  %p38_p13 = scmp.eq.s32.totalorder %s1771_s21, 0 }
  0x1a   : > { %p1896_p0 = por %p151_p2, %p37_p12  ;;  %p1466_p3 = scmp.lt.s32.totalorder %s1771_s21, 4 }
  0x1b   : > { %s1892_s9 = scalar_select %p28_p11, %s1767_s20, %s30_s8  }
  0x1c   : > { %s220_s7 = sand.u32 1, %s1767_s20   ;;  %s1391_s11 = sshll.u32 %s1771_s21, 5 }
  0x1d   : > { %p39_p5 = por %p38_p13, %p37_p12  ;;  %s1233_s12 = sshll.u32 %s220_s7, 5 }
  0x1e   : > { %s229_s15 = scalar_lea.hbm %s2333_s0, %s1391_s11  ;;  %s224_s17 = scalar_lea.vmem [#allocation2], %s1233_s12 }
  0x1f   : > { %s230_s16 = sshll.u32 %s229_s15, 4  ;;  %s232_s23 = sshll.u32 %s224_s17, 4  ;;  %s231_s16 = int_to_ptr.hbm [resolvable:$true] %s230_s16  ;;  %s233_s23 = int_to_ptr.vmem [resolvable:$true] %s232_s23 }
  0x20   : > { %p1906_p7 = pnand %p1466_p3, %p39_p5  ;;  %s221_s6 = scalar_lea.sflag [#allocation3], %s220_s7 }
  0x21   : > { %s1667_s8 = sshra.s32 %s231_s16, 4  ;;  %s1674_s12 = scalar_lea.hbm %s2333_s0, 128  ;;  %s1668_s8 = int_to_ptr.hbm [resolvable:$true] %s1667_s8 }
  0x22   : > { %s1669_s27 = scalar_lea.hbm %s1668_s8, 32  ;;  %p1671_p9 = pneg %p1906_p7 }
  0x23   : > { %p1670_p2 = scmp.ne.s32.totalorder %s1668_s8, %s1669_s27  ;;  %p1675_p12 = scmp.lt.s32.totalorder %s1668_s8, %s2333_s0 }
  0x24   : > { %p1676_p13 = scmp.lt.s32.totalorder %s1674_s12, %s1669_s27 }
  0x25   : > { %p1672_p10 = pnand %p1671_p9, %p1670_p2 }
  0x26   : > { %p1677_p3 = por %p1676_p13, %p1675_p12 }
  0x27   : > { %p1673_p11 = pneg %p1672_p10 }
  0x29   : > { %p1678_p5 = pnand %p1677_p3, %p1673_p11 }
  0x2b   : > { %1681 = shalt.err (!%p1678_p5)
}
  0x2c   : > { %s2354_s7 = smov 64   ;;  %244 = sbr.rel (%p1855_p8) target bundleno = 495 (0x1ef), region = 40 }
  0x2d   : > { %1458 = dma.hbm_to_vmem [thread:$0]  (!%p1906_p7), %s231_s16, 512, %s233_s23, %s221_s6, %s2354_s7, %s2354_s7, %s1779_s28  }
  0x31   : > { %s1926_s17 = sand.u32 1, %s1763_s19  }
  0x32   : > { %s1237_s8 = sshll.u32 %s1926_s17, 5  ;;  %s247_s27 = scalar_lea.sflag [#allocation3], %s1926_s17 }
  0x33   : > { %s1930_s11 = scalar_lea.vmem [#allocation2], %s1237_s8 }
  0x34   : > { %1742 = dma.done.wait (%p1842_p4), %s247_s27, 512  }
  0x35   : > { %1744 = vsyncadd (%p1842_p4), %s247_s27, 4294966784 }
  0x36   : > { %1746 = dma.done.wait (%p44_p1), [#allocation6], 2080  }
  0x37   : > { %1748 = vsyncadd (%p44_p1), [#allocation6], 4294965216 }
  0x38   : > { %1750 = dma.done.wait (%p44_p1), [#allocation9], 2048  }
  0x39   : > { %1752 = vsyncadd (%p44_p1), [#allocation9], 4294965248  ;;  %v1316_v0 = vld [vmem:[#allocation5 + $0x70] sm:$0xf]  ;;  %v1411_v1 = vld [vmem:[#allocation5 + $0x74] sm:$0xf0] }
  0x3a   : > { %v1410_v2 = vld [vmem:[#allocation5 + $0x74] sm:$0xf]  ;;  %v1317_v3 = vor.u32 %v1411_v1, %v1316_v0  ;;  %v1318_v4 = vld [vmem:[#allocation5 + $0x78] sm:$0xf0]  ;;  %v1308_v5 = vld [vmem:[#allocation5 + $0x60] sm:$0xf] }
  0x3b   : > { %v1409_v6 = vld [vmem:[#allocation5 + $0x64] sm:$0xf0]  ;;  %v1321_v7 = vor.u32 %v1410_v2, %v1318_v4  ;;  %v1408_v8 = vld [vmem:[#allocation5 + $0x64] sm:$0xf]  ;;  %v1310_v9 = vld [vmem:[#allocation5 + $0x68] sm:$0xf0] }
  0x3c   : > { %429 = vmatpush.bf16.msra.mxu0 %v1317_v3  ;;  %v1309_v10 = vor.u32 %v1409_v6, %v1308_v5  ;;  %v1313_v11 = vor.u32 %v1408_v8, %v1310_v9  ;;  %v1300_v12 = vld [vmem:[#allocation5 + $0x50] sm:$0xf]  ;;  %v1407_v13 = vld [vmem:[#allocation5 + $0x54] sm:$0xf0]  ;;  %v1406_v14 = vld [vmem:[#allocation5 + $0x54] sm:$0xf] }
  0x3d   : > { %458 = vmatpush.bf16.msra.mxu1 %v1321_v7  ;;  %v1302_v15 = vld [vmem:[#allocation5 + $0x58] sm:$0xf0]  ;;  %v1301_v16 = vor.u32 %v1407_v13, %v1300_v12  ;;  %v1292_v18 = vld [vmem:[#allocation5 + $0x40] sm:$0xf]  ;;  %v1405_v19 = vld [vmem:[#allocation5 + $0x44] sm:$0xf0] }
  0x3e   : > { %v1305_v17 = vor.u32 %v1406_v14, %v1302_v15  ;;  %v1404_v20 = vld [vmem:[#allocation5 + $0x44] sm:$0xf]  ;;  %v1294_v21 = vld [vmem:[#allocation5 + $0x48] sm:$0xf0]  ;;  %v1293_v22 = vor.u32 %v1405_v19, %v1292_v18  ;;  %v1284_v24 = vld [vmem:[#allocation5 + $0x30] sm:$0xf] }
  0x3f   : > { %v1297_v23 = vor.u32 %v1404_v20, %v1294_v21  ;;  %v1403_v25 = vld [vmem:[#allocation5 + $0x34] sm:$0xf0]  ;;  %v1402_v26 = vld [vmem:[#allocation5 + $0x34] sm:$0xf]  ;;  %v1286_v27 = vld [vmem:[#allocation5 + $0x38] sm:$0xf0] }
  0x40   : > { %430 = vmatpush.bf16.msra.mxu0 %v1309_v10  ;;  %v1285_v28 = vor.u32 %v1403_v25, %v1284_v24  ;;  %v1289_v29 = vor.u32 %v1402_v26, %v1286_v27  ;;  %v1276_v30 = vld [vmem:[#allocation5 + $0x20] sm:$0xf]  ;;  %v1401_v31 = vld [vmem:[#allocation5 + $0x24] sm:$0xf0]  ;;  %v1400_v32 = vld [vmem:[#allocation5 + $0x24] sm:$0xf] }
  0x41   : > { %459 = vmatpush.bf16.msra.mxu1 %v1313_v11  ;;  %v1278_v33 = vld [vmem:[#allocation5 + $0x28] sm:$0xf0]  ;;  %v1277_v34 = vor.u32 %v1401_v31, %v1276_v30  ;;  %v1268_v36 = vld [vmem:[#allocation5 + $0x10] sm:$0xf]  ;;  %v1399_v37 = vld [vmem:[#allocation5 + $0x14] sm:$0xf0] }
  0x42   : > { %v1281_v35 = vor.u32 %v1400_v32, %v1278_v33  ;;  %v1398_v38 = vld [vmem:[#allocation5 + $0x14] sm:$0xf]  ;;  %v1270_v39 = vld [vmem:[#allocation5 + $0x18] sm:$0xf0]  ;;  %v1269_v40 = vor.u32 %v1399_v37, %v1268_v36  ;;  %v1260_v42 = vld [vmem:[#allocation5] sm:$0xf] }
  0x43   : > { %v1273_v41 = vor.u32 %v1398_v38, %v1270_v39  ;;  %v1397_v43 = vld [vmem:[#allocation5 + $0x4] sm:$0xf0]  ;;  %v1396_v44 = vld [vmem:[#allocation5 + $0x4] sm:$0xf]  ;;  %v1262_v45 = vld [vmem:[#allocation5 + $0x8] sm:$0xf0] }
  0x44   : > { %431 = vmatpush.bf16.msra.mxu0 %v1301_v16  ;;  %v1261_v46 = vor.u32 %v1397_v43, %v1260_v42  ;;  %v1265_v47 = vor.u32 %v1396_v44, %v1262_v45  ;;  %v1392_v48 = vld [vmem:[%s1930_s11] sm:$0xff]  ;;  %v1393_v49 = vld [vmem:[%s1930_s11 + $0x8] sm:$0xff]  ;;  %v1394_v50 = vld [vmem:[%s1930_s11 + $0x10] sm:$0xff]  ;;  %s1241_s28 = sshll.u32 %s1926_s17, 6  ;;  %s1428_s23 = sshll.u32 %s1833_s22, 6 }
  0x45   : > { %460 = vmatpush.bf16.msra.mxu1 %v1305_v17  ;;  %v1395_v51 = vld [vmem:[%s1930_s11 + $0x18] sm:$0xff]  ;;  %v319_v54 = vld [vmem:[#allocation7] sm:$0x3]  ;;  %v1417_v62 = vld [vmem:[#allocation8 + $0x28] sm:$0xff]  ;;  %s2290_s16 = scalar_lea.vmem [#allocation10], %s1241_s28  ;;  %s1121_s13 = scalar_lea.hbm %s2338_s5, %s1428_s23 }
  0x46   : > { %v1419_v52 = vld [vmem:[#allocation8 + $0x38] sm:$0xff]  ;;  %v1948_v55 = vperm.slane %v319_v54, 0  ;;  %v1418_v56 = vld [vmem:[#allocation8 + $0x30] sm:$0xff]  ;;  %v1950_v58 = vperm.slane %v319_v54, 1  ;;  %v1425_v63 = vld [vmem:[#allocation8 + $0x68] sm:$0xff]  ;;  %s1122_s12 = sshll.u32 %s2290_s16, 4  ;;  %s1123_s12 = int_to_ptr.vmem [resolvable:$true] %s1122_s12 }
  0x47   : > { %v1427_v53 = vld [vmem:[#allocation8 + $0x78] sm:$0xff]  ;;  %1043 = vmatpush.bf16.msra.mxu2 %v1419_v52  ;;  %v1426_v57 = vld [vmem:[#allocation8 + $0x70] sm:$0xff]  ;;  %v1416_v3 = vld [vmem:[#allocation8 + $0x20] sm:$0xff]  ;;  %s1124_s14 = sshll.u32 %s1121_s13, 4  ;;  %s1110_s15 = scalar_lea.sflag [#allocation4], %s1926_s17  ;;  %s1125_s14 = int_to_ptr.hbm [resolvable:$true] %s1124_s14 }
  0x48   : > { %432 = vmatpush.bf16.msra.mxu0 %v1293_v22  ;;  %1072 = vmatpush.bf16.msra.mxu3 %v1427_v53  ;;  %v1424_v4 = vld [vmem:[#allocation8 + $0x60] sm:$0xff]  ;;  %v1415_v11 = vld [vmem:[#allocation8 + $0x18] sm:$0xff]  ;;  %v1414_v17 = vld [vmem:[#allocation8 + $0x10] sm:$0xff]  ;;  %s1711_s7 = sshra.s32 %s1125_s14, 4  ;;  %s1717_s11 = scalar_lea.hbm %s2338_s5, 256  ;;  %s1712_s7 = int_to_ptr.hbm [resolvable:$true] %s1711_s7 }
  0x49   : > { %461 = vmatpush.bf16.msra.mxu1 %v1297_v23  ;;  %v1423_v12 = vld [vmem:[#allocation8 + $0x58] sm:$0xff]  ;;  %v1422_v18 = vld [vmem:[#allocation8 + $0x50] sm:$0xff]  ;;  %v1421_v30 = vld [vmem:[#allocation8 + $0x48] sm:$0xff]  ;;  %s1713_s22 = scalar_lea.hbm %s1712_s7, 64  ;;  %p1718_p7 = scmp.lt.s32.totalorder %s1712_s7, %s2338_s5 }
  0x4a   : > { %v1412_v38 = vld [vmem:[#allocation8] sm:$0xff]  ;;  %p1714_p1 = scmp.ne.s32.totalorder %s1712_s7, %s1713_s22  ;;  %p1719_p2 = scmp.lt.s32.totalorder %s1717_s11, %s1713_s22 }
  0x4b   : > { %1044 = vmatpush.bf16.msra.mxu2 %v1418_v56  ;;  %v1420_v39 = vld [vmem:[#allocation8 + $0x40] sm:$0xff] }
  0x4c   : > { %433 = vmatpush.bf16.msra.mxu0 %v1285_v28  ;;  %1073 = vmatpush.bf16.msra.mxu3 %v1426_v57  ;;  %p1715_p4 = pnand %p1714_p1, %p1896_p0  ;;  %p1720_p9 = por %p1719_p2, %p1718_p7 }
  0x4d   : > { %462 = vmatpush.bf16.msra.mxu1 %v1289_v29  ;;  %v1413_v29 = vld [vmem:[#allocation8 + $0x8] sm:$0xff] }
  0x4e   : > { %p1716_p8 = pneg %p1715_p4 }
  0x4f   : > { %1045 = vmatpush.bf16.msra.mxu2 %v1417_v62 }
  0x50   : > { %434 = vmatpush.bf16.msra.mxu0 %v1277_v34  ;;  %1074 = vmatpush.bf16.msra.mxu3 %v1425_v63  ;;  %p1721_p10 = pnand %p1720_p9, %p1716_p8 }
  0x51   : > { %463 = vmatpush.bf16.msra.mxu1 %v1281_v35 }
  0x53   : > { %1046 = vmatpush.bf16.msra.mxu2 %v1416_v3 }
  0x54   : > { %435 = vmatpush.bf16.msra.mxu0 %v1269_v40  ;;  %1075 = vmatpush.bf16.msra.mxu3 %v1424_v4 }
  0x55   : > { %464 = vmatpush.bf16.msra.mxu1 %v1273_v41 }
  0x57   : > { %1047 = vmatpush.bf16.msra.mxu2 %v1415_v11 }
  0x58   : > { %436 = vmatpush.bf16.msra.mxu0 %v1261_v46  ;;  %1076 = vmatpush.bf16.msra.mxu3 %v1423_v12 }
  0x59   : > { %465 = vmatpush.bf16.msra.mxu1 %v1265_v47 }
  0x5b   : > { %437 = vmatmul.bf16.vlgmr.msra.gmra.mxu0 %v1392_v48  ;;  %1048 = vmatpush.bf16.msra.mxu2 %v1414_v17 }
  0x5c   : > { %466 = vmatmul.bf16.vlgmr.msra.gmra.mxu1 %v1392_v48  ;;  %1077 = vmatpush.bf16.msra.mxu3 %v1422_v18 }
  0x5f   : > { %1049 = vmatpush.bf16.msra.mxu2 %v1413_v29 }
  0x60   : > { %1078 = vmatpush.bf16.msra.mxu3 %v1421_v30 }
  0x63   : > { %1050 = vmatpush.bf16.msra.mxu2 %v1412_v38 }
  0x64   : > { %1079 = vmatpush.bf16.msra.mxu3 %v1420_v39 }
  0x6b   : > { %442 = vmatmul.bf16.gmra.mxu0 %v1393_v49 }
  0x6c   : > { %471 = vmatmul.bf16.gmra.mxu1 %v1393_v49 }
  0x7b   : > { %447 = vmatmul.bf16.gmra.mxu0 %v1394_v50 }
  0x7c   : > { %476 = vmatmul.bf16.gmra.mxu1 %v1394_v50 }
  0x8b   : > { %452 = vmatmul.bf16.gmra.mxu0 %v1395_v51 }
  0x8c   : > { %481 = vmatmul.bf16.gmra.mxu1 %v1395_v51 }
  0xd8   : > { %v438_v59 = vpop.f32.mrf.mxu0 }
  0xd9   : > { %v1953_v60 = vadd.f32 %v438_v59, %v1948_v55  ;;  %v467_v61 = vpop.f32.mrf.mxu1 }
  0xda   : > { %v1959_v1 = vadd.f32 %v467_v61, %v1950_v58 }
  0xdb   : > { %v1956_v0 = vmul.f32 0.70710677, %v1953_v60  ;;  %v1990_v56 = vmul.f32 0.5, %v1953_v60 }
  0xdc   : > { %v1963_v6 = vmul.f32 0.70710677, %v1959_v1  ;;  %v1993_v57 = vmul.f32 0.5, %v1959_v1 }
  0xdd   : > { %v519_v2 = vand.u32 2147483647, %v1956_v0  ;;  %vm823_vm0 = vcmp.ge.f32.partialorder %v1956_v0, 0.0 }
  0xde   : > { %v520_v13 = vand.u32 2147483647, %v1963_v6  ;;  %vm824_vm2 = vcmp.ge.f32.partialorder %v1963_v6, 0.0 }
  0xdf   : > { %v535_v5 = vmul.f32 0.3275911, %v519_v2  ;;  %v727_v22 = vsub.f32 0.0, %v519_v2 }
  0xe0   : > { %v440_v7 = vpop.f32.mrf.mxu0  ;;  %v536_v19 = vmul.f32 0.3275911, %v520_v13  ;;  %v728_v25 = vsub.f32 0.0, %v520_v13 }
  0xe1   : > { %v551_v8 = vadd.f32 1.0, %v535_v5  ;;  %v441_v9 = vadd.f32 %v440_v7, %v1948_v55  ;;  %v469_v10 = vpop.f32.mrf.mxu1  ;;  %v743_v34 = vmul.f32 %v727_v22, %v519_v2 }
  0xe2   : > { %v470_v15 = vadd.f32 %v469_v10, %v1950_v58  ;;  %v552_v32 = vadd.f32 1.0, %v536_v19  ;;  %v744_v36 = vmul.f32 %v728_v25, %v520_v13 }
  0xe3   : > { %1513 = vrcp.f32 %v551_v8  ;;  %v1967_v14 = vmul.f32 0.70710677, %v441_v9  ;;  %v759_v43 = vmul.f32 1.442695, %v743_v34  ;;  %v1996_v62 = vmul.f32 0.5, %v441_v9 }
  0xe4   : > { %v1971_v21 = vmul.f32 0.70710677, %v470_v15  ;;  %v761_v47 = vmul.f32 1.442695, %v744_v36  ;;  %v1998_v63 = vmul.f32 0.5, %v470_v15 }
  0xe5   : > { %v521_v16 = vand.u32 2147483647, %v1967_v14  ;;  %vm825_vm1 = vcmp.ge.f32.partialorder %v1967_v14, 0.0 }
  0xe6   : > { %v522_v33 = vand.u32 2147483647, %v1971_v21  ;;  %vm826_vm3 = vcmp.ge.f32.partialorder %v1971_v21, 0.0 }
  0xe7   : > { %v537_v20 = vmul.f32 0.3275911, %v521_v16  ;;  %v729_v40 = vsub.f32 0.0, %v521_v16 }
  0xe8   : > { %v443_v23 = vpop.f32.mrf.mxu0  ;;  %v730_v42 = vsub.f32 0.0, %v522_v33  ;;  %v538_v52 = vmul.f32 0.3275911, %v522_v33 }
  0xe9   : > { %v1973_v24 = vpop.eup %1513  ;;  %v553_v26 = vadd.f32 1.0, %v537_v20  ;;  %v444_v27 = vadd.f32 %v443_v23, %v1948_v55  ;;  %v472_v28 = vpop.f32.mrf.mxu1  ;;  %v745_v51 = vmul.f32 %v729_v40, %v521_v16 }
  0xea   : > { %v583_v31 = vmul.f32 1.0614054, %v1973_v24  ;;  %v473_v35 = vadd.f32 %v472_v28, %v1950_v58  ;;  %v746_v59 = vmul.f32 %v730_v42, %v522_v33  ;;  %v554_v1 = vadd.f32 1.0, %v538_v52 }
  0xeb   : > { %1515 = vrcp.f32 %v553_v26  ;;  %v1979_v37 = vmul.f32 0.70710677, %v444_v27  ;;  %v763_v7 = vmul.f32 1.442695, %v745_v51  ;;  %v2005_v12 = vmul.f32 0.5, %v444_v27 }
  0xec   : > { %v599_v41 = vadd.f32 -1.4531521, %v583_v31  ;;  %1517 = vrcp.f32 %v552_v32  ;;  %v1981_v44 = vmul.f32 0.70710677, %v473_v35  ;;  %v765_v11 = vmul.f32 1.442695, %v746_v59 }
  0xed   : > { %v523_v48 = vand.u32 2147483647, %v1979_v37  ;;  %1519 = vpow2.f32 %v759_v43  ;;  %v2021_v32 = vmul.f32 0.5, %v473_v35  ;;  %vm827_vm4 = vcmp.ge.f32.partialorder %v1979_v37, 0.0 }
  0xee   : > { %v615_v54 = vmul.f32 %v1973_v24, %v599_v41  ;;  %v524_v2 = vand.u32 2147483647, %v1981_v44  ;;  %1521 = vpow2.f32 %v761_v47  ;;  %vm828_vm6 = vcmp.ge.f32.partialorder %v1981_v44, 0.0 }
  0xef   : > { %v539_v4 = vmul.f32 0.3275911, %v523_v48  ;;  %v731_v8 = vsub.f32 0.0, %v523_v48  ;;  %1523 = vrcp.f32 %v554_v1 }
  0xf0   : > { %v445_v45 = vpop.f32.mrf.mxu0  ;;  %v631_v10 = vadd.f32 1.4214138, %v615_v54  ;;  %v540_v15 = vmul.f32 0.3275911, %v524_v2  ;;  %v732_v16 = vsub.f32 0.0, %v524_v2  ;;  %1525 = vpow2.f32 %v763_v7 }
  0xf1   : > { %v1983_v46 = vpop.eup %1515  ;;  %v446_v49 = vadd.f32 %v445_v45, %v1948_v55  ;;  %v474_v50 = vpop.f32.mrf.mxu1  ;;  %v555_v20 = vadd.f32 1.0, %v539_v4  ;;  %v747_v28 = vmul.f32 %v731_v8, %v523_v48  ;;  %1527 = vpow2.f32 %v765_v11 }
  0xf2   : > { %v585_v53 = vmul.f32 1.0614054, %v1983_v46  ;;  %v475_v61 = vadd.f32 %v474_v50, %v1950_v58  ;;  %v2001_v3 = vpop.eup %1517  ;;  %v647_v18 = vmul.f32 %v1973_v24, %v631_v10  ;;  %v556_v36 = vadd.f32 1.0, %v540_v15 }
  0xf3   : > { %v2003_v5 = vmul.f32 0.70710677, %v446_v49  ;;  %v584_v19 = vmul.f32 1.0614054, %v2001_v3  ;;  %v1520_v27 = vpop.eup %1519  ;;  %v748_v38 = vmul.f32 %v732_v16, %v524_v2  ;;  %1529 = vrcp.f32 %v555_v20 }
  0xf4   : > { %v601_v60 = vadd.f32 -1.4531521, %v585_v53  ;;  %v2007_v9 = vmul.f32 0.70710677, %v475_v61  ;;  %v663_v30 = vadd.f32 -0.28449672, %v647_v18  ;;  %v2019_v31 = vpop.eup %1521  ;;  %1531 = vrcp.f32 %v556_v36 }
  0xf5   : > { %v525_v22 = vand.u32 2147483647, %v2003_v5  ;;  %v600_v42 = vadd.f32 -1.4531521, %v584_v19  ;;  %v767_v43 = vmul.f32 1.442695, %v747_v28  ;;  %v2036_v53 = vpop.eup %1523 }
  0xf6   : > { %v617_v13 = vmul.f32 %v1983_v46, %v601_v60  ;;  %v526_v33 = vand.u32 2147483647, %v2007_v9  ;;  %v679_v47 = vmul.f32 %v1973_v24, %v663_v30  ;;  %v2033_v48 = vmul.f32 0.5, %v446_v49  ;;  %v1526_v60 = vpop.eup %1525 }
  0xf7   : > { %v541_v40 = vmul.f32 0.3275911, %v525_v22  ;;  %v733_v45 = vsub.f32 0.0, %v525_v22  ;;  %v769_v54 = vmul.f32 1.442695, %v748_v38  ;;  %v2038_v1 = vmul.f32 0.5, %v475_v61  ;;  %v2042_v11 = vpop.eup %1527 }
  0xf8   : > { %v448_v17 = vpop.f32.mrf.mxu0  ;;  %v633_v26 = vadd.f32 1.4214138, %v617_v13  ;;  %v734_v50 = vsub.f32 0.0, %v526_v33  ;;  %v542_v59 = vmul.f32 0.3275911, %v526_v33  ;;  %1533 = vpow2.f32 %v767_v43 }
  0xf9   : > { %v2014_v23 = vadd.f32 %v448_v17, %v1948_v55  ;;  %v477_v25 = vpop.f32.mrf.mxu1  ;;  %v695_v4 = vadd.f32 0.2548296, %v679_v47  ;;  %v557_v7 = vadd.f32 1.0, %v541_v40  ;;  %v749_v13 = vmul.f32 %v733_v45, %v525_v22  ;;  %v2046_v18 = vpop.eup %1529 }
  0xfa   : > { %v2017_v29 = vadd.f32 %v477_v25, %v1950_v58  ;;  %v649_v41 = vmul.f32 %v1983_v46, %v633_v26  ;;  %v750_v19 = vmul.f32 %v734_v50, %v526_v33  ;;  %v586_v61 = vmul.f32 1.0614054, %v2036_v53  ;;  %v2054_v40 = vpop.eup %1531 }
  0xfb   : > { %v2025_v34 = vmul.f32 0.70710677, %v2014_v23  ;;  %v711_v17 = vmul.f32 %v1973_v24, %v695_v4  ;;  %1535 = vpow2.f32 %v769_v54  ;;  %v558_v25 = vadd.f32 1.0, %v542_v59 }
  0xfc   : > { %v2028_v39 = vmul.f32 0.70710677, %v2017_v29  ;;  %v665_v52 = vadd.f32 -0.28449672, %v649_v41  ;;  %v616_v38 = vmul.f32 %v2001_v3, %v600_v42  ;;  %1537 = vrcp.f32 %v557_v7 }
  0xfd   : > { %v527_v35 = vand.u32 2147483647, %v2025_v34  ;;  %v771_v24 = vmul.f32 1.442695, %v749_v13  ;;  %v791_v41 = vmul.f32 %v1520_v27, %v711_v17  ;;  %v773_v43 = vmul.f32 1.442695, %v750_v19 }
  0xfe   : > { %v528_v51 = vand.u32 2147483647, %v2028_v39  ;;  %v681_v49 = vmul.f32 %v1983_v46, %v665_v52  ;;  %v2058_v45 = vmul.f32 0.5, %v2014_v23  ;;  %1539 = vrcp.f32 %v558_v25 }
  0xff   : > { %v735_v15 = vsub.f32 0.0, %v527_v35  ;;  %v543_v26 = vmul.f32 0.3275911, %v527_v35  ;;  %v807_v59 = vsub.f32 1.0, %v791_v41  ;;  %1541 = vpow2.f32 %v771_v24 }
 0x100   : > { %v450_v2 = vpop.f32.mrf.mxu0  ;;  %v736_v20 = vsub.f32 0.0, %v528_v51  ;;  %v544_v30 = vmul.f32 0.3275911, %v528_v51  ;;  %v697_v22 = vadd.f32 0.2548296, %v681_v49  ;;  %1543 = vpow2.f32 %v773_v43 }
 0x101   : > { %v451_v8 = vadd.f32 %v450_v2, %v1948_v55  ;;  %v479_v10 = vpop.f32.mrf.mxu1  ;;  %v751_v33 = vmul.f32 %v735_v15, %v527_v35  ;;  %v559_v52 = vadd.f32 1.0, %v543_v26  ;;  %v2063_v2 = vpop.eup %1533  ;;  %v839_v17 = vsub.f32 0.0, %v807_v59 }
 0x102   : > { %v480_v16 = vadd.f32 %v479_v10, %v1950_v58  ;;  %v752_v47 = vmul.f32 %v736_v20, %v528_v51  ;;  %v713_v50 = vmul.f32 %v1983_v46, %v697_v22  ;;  %v560_v4 = vadd.f32 1.0, %v544_v30  ;;  %v2069_v7 = vpop.eup %1535 }
 0x103   : > { %v2049_v28 = vmul.f32 0.70710677, %v451_v8  ;;  %v775_v46 = vmul.f32 1.442695, %v751_v33  ;;  %v2072_v10 = vmul.f32 0.5, %v2017_v29  ;;  %v2080_v19 = vpop.eup %1537  ;;  %1545 = vrcp.f32 %v559_v52 }
 0x104   : > { %v2051_v36 = vmul.f32 0.70710677, %v480_v16  ;;  %v793_v51 = vmul.f32 %v1526_v60, %v713_v50  ;;  %v777_v13 = vmul.f32 1.442695, %v752_v47  ;;  %1547 = vrcp.f32 %v560_v4  ;;  %v2086_v22 = vpop.eup %1539 }
 0x105   : > { %v529_v42 = vand.u32 2147483647, %v2049_v28  ;;  %2356 = vst [vmem:[#allocation16_spill] sm:$0xff] %v2072_v10  ;;  %1549 = vpow2.f32 %v775_v46  ;;  %v2088_v24 = vmul.f32 0.5, %v451_v8  ;;  %v2090_v33 = vmul.f32 0.5, %v480_v16 }
 0x106   : > { %v530_v27 = vand.u32 2147483647, %v2051_v36  ;;  %v809_v30 = vsub.f32 1.0, %v793_v51  ;;  %v855_v50 = vsel %vm823_vm0, %v807_v59, %v839_v17  ;;  %v602_v52 = vadd.f32 -1.4531521, %v586_v61 }
 0x107   : > { %v545_v60 = vmul.f32 0.3275911, %v529_v42  ;;  %v737_v20 = vsub.f32 0.0, %v529_v42  ;;  %2360 = vst [vmem:[#allocation20_spill] sm:$0xff] %v2090_v33  ;;  %1551 = vpow2.f32 %v777_v13  ;;  %vm829_vm5 = vcmp.ge.f32.partialorder %v2003_v5, 0.0 }
 0x108   : > { %v453_v54 = vpop.f32.mrf.mxu0  ;;  %v738_v29 = vsub.f32 0.0, %v530_v27  ;;  %v546_v43 = vmul.f32 0.3275911, %v530_v27  ;;  %v841_v47 = vsub.f32 0.0, %v809_v30  ;;  %vm830_vm7 = vcmp.ge.f32.partialorder %v2007_v9, 0.0 }
 0x109   : > { %v2067_v35 = vadd.f32 %v453_v54, %v1948_v55  ;;  %v482_v23 = vpop.f32.mrf.mxu1  ;;  %v2095_v54 = vpop.eup %1541  ;;  %v561_v4 = vadd.f32 1.0, %v545_v60  ;;  %vm833_vm8 = vcmp.ge.f32.partialorder %v2049_v28, 0.0  ;;  %vm831_vm9 = vcmp.ge.f32.partialorder %v2025_v34, 0.0 }
 0x10a   : > { %v2075_v49 = vadd.f32 %v482_v23, %v1950_v58  ;;  %v753_v23 = vmul.f32 %v737_v20, %v529_v42  ;;  %v2097_v46 = vpop.eup %1543  ;;  %v754_v8 = vmul.f32 %v738_v29, %v530_v27  ;;  %v857_v0 = vsel %vm825_vm1, %v809_v30, %v841_v47 }
 0x10b   : > { %2355 = vst [vmem:[#allocation15_spill] sm:$0xff] %v2067_v35  ;;  %v2078_v15 = vmul.f32 0.70710677, %v2067_v35  ;;  %v2104_v59 = vpop.eup %1545  ;;  %v871_v42 = vadd.f32 1.0, %v855_v50  ;;  %v873_v17 = vadd.f32 1.0, %v857_v0  ;;  %v562_v60 = vadd.f32 1.0, %v546_v43 }
 0x10c   : > { %2357 = vst [vmem:[#allocation17_spill] sm:$0xff] %v2075_v49  ;;  %v2083_v25 = vmul.f32 0.70710677, %v2075_v49  ;;  %v632_v49 = vadd.f32 1.4214138, %v616_v38  ;;  %v2109_v38 = vpop.eup %1547  ;;  %1553 = vrcp.f32 %v561_v4  ;;  %vm832_vm10 = vcmp.ge.f32.partialorder %v2028_v39, 0.0 }
 0x10d   : > { %2358 = vst [vmem:[#allocation18_spill] sm:$0xff] %v2078_v15  ;;  %v531_v26 = vand.u32 2147483647, %v2078_v15  ;;  %v2115_v29 = vpop.eup %1549  ;;  %v2121_v47 = vmul.f32 1.442695, %v754_v8  ;;  %v887_v4 = vmul.f32 %v871_v42, %v1990_v56  ;;  %1555 = vrcp.f32 %v562_v60 }
 0x10e   : > { %2359 = vst [vmem:[#allocation19_spill] sm:$0xff] %v2083_v25  ;;  %v532_v41 = vand.u32 2147483647, %v2083_v25  ;;  %v589_v60 = vmul.f32 1.0614054, %v2080_v19  ;;  %vm834_vm11 = vcmp.ge.f32.partialorder %v2051_v36, 0.0 }
 0x10f   : > { %v739_v16 = vsub.f32 0.0, %v531_v26  ;;  %v547_v27 = vmul.f32 0.3275911, %v531_v26  ;;  %v592_v21 = vmul.f32 1.0614054, %v2109_v38  ;;  %v2368_v36 = vld [vmem:[#allocation20_spill] sm:$0xff] }
 0x110   : > { %v455_v51 = vpop.f32.mrf.mxu0  ;;  %v740_v61 = vsub.f32 0.0, %v532_v41  ;;  %v548_v14 = vmul.f32 0.3275911, %v532_v41 }
 0x111   : > { %v2100_v35 = vadd.f32 %v455_v51, %v1948_v55  ;;  %v484_v25 = vpop.f32.mrf.mxu1  ;;  %v618_v55 = vmul.f32 %v2036_v53, %v602_v52  ;;  %v755_v50 = vmul.f32 %v739_v16, %v531_v26  ;;  %v2126_v51 = vpop.eup %1551 }
 0x112   : > { %v2107_v13 = vadd.f32 %v484_v25, %v1950_v58  ;;  %v648_v58 = vmul.f32 %v2001_v3, %v632_v49  ;;  %v779_v25 = vmul.f32 1.442695, %v753_v23  ;;  %v756_v0 = vmul.f32 %v740_v61, %v532_v41  ;;  %v2139_v56 = vpop.eup %1553 }
 0x113   : > { %2361 = vst [vmem:[#allocation21_spill] sm:$0xff] %v2100_v35  ;;  %v2112_v20 = vmul.f32 0.70710677, %v2100_v35  ;;  %v563_v35 = vadd.f32 1.0, %v547_v27  ;;  %v634_v23 = vadd.f32 1.4214138, %v618_v55 }
 0x114   : > { %2362 = vst [vmem:[#allocation22_spill] sm:$0xff] %v2107_v13  ;;  %v2118_v30 = vmul.f32 0.70710677, %v2107_v13  ;;  %v889_v13 = vmul.f32 %v873_v17, %v1996_v62  ;;  %v564_v8 = vadd.f32 1.0, %v548_v14  ;;  %1557 = vpow2.f32 %v779_v25 }
 0x115   : > { %2363 = vst [vmem:[#allocation23_spill] sm:$0xff] %v2112_v20  ;;  %v2124_v43 = vand.u32 2147483647, %v2112_v20  ;;  %v664_v20 = vadd.f32 -0.28449672, %v648_v58  ;;  %v650_v41 = vmul.f32 %v2036_v53, %v634_v23  ;;  %1559 = vrcp.f32 %v563_v35 }
 0x116   : > { %2364 = vst [vmem:[#allocation24_spill] sm:$0xff] %v2118_v30  ;;  %v2129_v52 = vand.u32 2147483647, %v2118_v30  ;;  %v903_v16 = vpack.c.bf16 %v889_v13, %v887_v4  ;;  %v2135_v15 = vmul.f32 1.442695, %v755_v50  ;;  %1561 = vrcp.f32 %v564_v8  ;;  %v2146_v50 = vpop.eup %1555 }
 0x117   : > { %v549_v49 = vmul.f32 0.3275911, %v2124_v43  ;;  %v587_v61 = vmul.f32 1.0614054, %v2046_v18  ;;  %v2141_v62 = vmul.f32 1.442695, %v756_v0  ;;  %v680_v17 = vmul.f32 %v2001_v3, %v664_v20 }
 0x118   : > { %v550_v26 = vmul.f32 0.3275911, %v2129_v52  ;;  %1051 = vmatmul.bf16.vlgmr.msra.gmra.mxu2 %v903_v16  ;;  %v666_v27 = vadd.f32 -0.28449672, %v650_v41  ;;  %v605_v25 = vadd.f32 -1.4531521, %v589_v60 }
 0x119   : > { %v565_v42 = vadd.f32 1.0, %v549_v49  ;;  %v603_v55 = vadd.f32 -1.4531521, %v587_v61  ;;  %v696_v58 = vadd.f32 0.2548296, %v680_v17 }
 0x11a   : > { %v566_v13 = vadd.f32 1.0, %v550_v26  ;;  %v682_v4 = vmul.f32 %v2036_v53, %v666_v27  ;;  %v588_v35 = vmul.f32 1.0614054, %v2054_v40  ;;  %v621_v23 = vmul.f32 %v2080_v19, %v605_v25  ;;  %v2156_v26 = vpop.eup %1557 }
 0x11b   : > { %v619_v20 = vmul.f32 %v2046_v18, %v603_v55  ;;  %1563 = vrcp.f32 %v565_v42  ;;  %v712_v49 = vmul.f32 %v2001_v3, %v696_v58  ;;  %v590_v8 = vmul.f32 1.0614054, %v2086_v22  ;;  %v2161_v55 = vpop.eup %1559 }
 0x11c   : > { %1565 = vrcp.f32 %v566_v13  ;;  %v698_v16 = vadd.f32 0.2548296, %v682_v4  ;;  %v604_v61 = vadd.f32 -1.4531521, %v588_v35  ;;  %v637_v60 = vadd.f32 1.4214138, %v621_v23  ;;  %v2167_v4 = vpop.eup %1561 }
 0x11d   : > { %v635_v41 = vadd.f32 1.4214138, %v619_v20  ;;  %v792_v17 = vmul.f32 %v2019_v31, %v712_v49  ;;  %v606_v27 = vadd.f32 -1.4531521, %v590_v8  ;;  %v591_v42 = vmul.f32 1.0614054, %v2104_v59 }
 0x11e   : > { %v714_v3 = vmul.f32 %v2036_v53, %v698_v16  ;;  %v620_v25 = vmul.f32 %v2054_v40, %v604_v61  ;;  %v593_v13 = vmul.f32 1.0614054, %v2139_v56  ;;  %v653_v35 = vmul.f32 %v2080_v19, %v637_v60 }
 0x11f   : > { %v651_v58 = vmul.f32 %v2046_v18, %v635_v41  ;;  %v808_v20 = vsub.f32 1.0, %v792_v17  ;;  %v622_v31 = vmul.f32 %v2086_v22, %v606_v27  ;;  %v607_v49 = vadd.f32 -1.4531521, %v591_v42 }
 0x120   : > { %v794_v23 = vmul.f32 %v2042_v11, %v714_v3  ;;  %v636_v0 = vadd.f32 1.4214138, %v620_v25  ;;  %v609_v14 = vadd.f32 -1.4531521, %v593_v13  ;;  %v669_v41 = vadd.f32 -0.28449672, %v653_v35 }
 0x121   : > { %v667_v8 = vadd.f32 -0.28449672, %v651_v58  ;;  %v2172_v53 = vpop.eup %1563  ;;  %v840_v16 = vsub.f32 0.0, %v808_v20  ;;  %v638_v61 = vadd.f32 1.4214138, %v622_v31  ;;  %v623_v30 = vmul.f32 %v2104_v59, %v607_v49 }
 0x122   : > { %v2175_v33 = vpop.eup %1565  ;;  %v810_v17 = vsub.f32 1.0, %v794_v23  ;;  %v652_v27 = vmul.f32 %v2054_v40, %v636_v0  ;;  %v625_v42 = vmul.f32 %v2139_v56, %v609_v14  ;;  %v685_v3 = vmul.f32 %v2080_v19, %v669_v41 }
 0x123   : > { %v683_v60 = vmul.f32 %v2046_v18, %v667_v8  ;;  %v856_v11 = vsel %vm824_vm2, %v808_v20, %v840_v16  ;;  %v654_v58 = vmul.f32 %v2086_v22, %v638_v61  ;;  %v639_v25 = vadd.f32 1.4214138, %v623_v30 }
 0x124   : > { %v842_v13 = vsub.f32 0.0, %v810_v17  ;;  %v872_v35 = vadd.f32 1.0, %v856_v11  ;;  %v668_v49 = vadd.f32 -0.28449672, %v652_v27  ;;  %v701_v23 = vadd.f32 0.2548296, %v685_v3 }
 0x125   : > { %v699_v31 = vadd.f32 0.2548296, %v683_v60  ;;  %v670_v8 = vadd.f32 -0.28449672, %v654_v58  ;;  %v641_v10 = vadd.f32 1.4214138, %v625_v42  ;;  %v655_v0 = vmul.f32 %v2104_v59, %v639_v25 }
 0x126   : > { %v858_v6 = vsel %vm826_vm3, %v810_v17, %v842_v13  ;;  %v888_v14 = vmul.f32 %v872_v35, %v1993_v57  ;;  %v684_v20 = vmul.f32 %v2054_v40, %v668_v49  ;;  %v717_v41 = vmul.f32 %v2080_v19, %v701_v23 }
 0x127   : > { %v715_v30 = vmul.f32 %v2046_v18, %v699_v31  ;;  %v874_v16 = vadd.f32 1.0, %v858_v6  ;;  %v686_v61 = vmul.f32 %v2086_v22, %v670_v8  ;;  %v657_v60 = vmul.f32 %v2139_v56, %v641_v10 }
 0x128   : > { %v700_v42 = vadd.f32 0.2548296, %v684_v20  ;;  %v671_v11 = vadd.f32 -0.28449672, %v655_v0  ;;  %v797_v18 = vmul.f32 %v2095_v54, %v717_v41  ;;  %v608_v23 = vadd.f32 -1.4531521, %v592_v21 }
 0x129   : > { %v795_v27 = vmul.f32 %v2063_v2, %v715_v30  ;;  %v890_v57 = vmul.f32 %v874_v16, %v1998_v63  ;;  %v702_v17 = vadd.f32 0.2548296, %v686_v61  ;;  %v673_v3 = vadd.f32 -0.28449672, %v657_v60 }
 0x12a   : > { %v716_v58 = vmul.f32 %v2054_v40, %v700_v42  ;;  %v687_v10 = vmul.f32 %v2104_v59, %v671_v11  ;;  %v594_v2 = vmul.f32 1.0614054, %v2146_v50  ;;  %v813_v13 = vsub.f32 1.0, %v797_v18 }
 0x12b   : > { %v811_v19 = vsub.f32 1.0, %v795_v27  ;;  %v904_v25 = vpack.c.bf16 %v890_v57, %v888_v14  ;;  %v718_v35 = vmul.f32 %v2086_v22, %v702_v17  ;;  %v689_v31 = vmul.f32 %v2139_v56, %v673_v3 }
 0x12c   : > { %v796_v54 = vmul.f32 %v2069_v7, %v716_v58  ;;  %v703_v49 = vadd.f32 0.2548296, %v687_v10  ;;  %v845_v8 = vsub.f32 0.0, %v813_v13  ;;  %v610_v6 = vadd.f32 -1.4531521, %v594_v2 }
 0x12d   : > { %v843_v63 = vsub.f32 0.0, %v811_v19  ;;  %1080 = vmatmul.bf16.vlgmr.msra.gmra.mxu3 %v904_v25  ;;  %v798_v0 = vmul.f32 %v2097_v46, %v718_v35  ;;  %v705_v40 = vadd.f32 0.2548296, %v689_v31  ;;  %v624_v20 = vmul.f32 %v2109_v38, %v608_v23 }
 0x12e   : > { %v812_v30 = vsub.f32 1.0, %v796_v54  ;;  %v719_v22 = vmul.f32 %v2104_v59, %v703_v49  ;;  %v861_v7 = vsel %vm829_vm5, %v813_v13, %v845_v8  ;;  %v626_v37 = vmul.f32 %v2146_v50, %v610_v6 }
 0x12f   : > { %v859_v14 = vsel %vm827_vm4, %v811_v19, %v843_v63  ;;  %v814_v41 = vsub.f32 1.0, %v798_v0  ;;  %v721_v46 = vmul.f32 %v2139_v56, %v705_v40  ;;  %v877_v61 = vadd.f32 1.0, %v861_v7 }
 0x130   : > { %v875_v16 = vadd.f32 1.0, %v859_v14  ;;  %v844_v60 = vsub.f32 0.0, %v812_v30  ;;  %v799_v27 = vmul.f32 %v2115_v29, %v719_v22  ;;  %v640_v21 = vadd.f32 1.4214138, %v624_v20 }
 0x131   : > { %v846_v59 = vsub.f32 0.0, %v814_v41  ;;  %v801_v11 = vmul.f32 %v2156_v26, %v721_v46  ;;  %v893_v57 = vmul.f32 %v877_v61, %v2033_v48  ;;  %v642_v17 = vadd.f32 1.4214138, %v626_v37 }
 0x132   : > { %v891_v42 = vmul.f32 %v875_v16, %v2005_v12  ;;  %v860_v5 = vsel %vm828_vm6, %v812_v30, %v844_v60  ;;  %v815_v18 = vsub.f32 1.0, %v799_v27  ;;  %v656_v19 = vmul.f32 %v2109_v38, %v640_v21 }
 0x133   : > { %v862_v56 = vsel %vm830_vm7, %v814_v41, %v846_v59  ;;  %v876_v3 = vadd.f32 1.0, %v860_v5  ;;  %v817_v29 = vsub.f32 1.0, %v801_v11  ;;  %v658_v26 = vmul.f32 %v2146_v50, %v642_v17 }
 0x134   : > { %v905_v58 = vpack.c.bf16 %v893_v57, %v891_v42  ;;  %v878_v12 = vadd.f32 1.0, %v862_v56  ;;  %v847_v10 = vsub.f32 0.0, %v815_v18  ;;  %1567 = vpow2.f32 %v2121_v47 }
 0x135   : > { %v849_v48 = vsub.f32 0.0, %v817_v29  ;;  %v672_v2 = vadd.f32 -0.28449672, %v656_v19  ;;  %v595_v44 = vmul.f32 1.0614054, %v2161_v55  ;;  %v2365_v25 = vsub.f32 0.0, %v2124_v43 }
 0x136   : > { %1056 = vmatmul.bf16.gmra.mxu2 %v905_v58  ;;  %v894_v13 = vmul.f32 %v878_v12, %v2038_v1  ;;  %v674_v35 = vadd.f32 -0.28449672, %v658_v26  ;;  %v597_v31 = vmul.f32 1.0614054, %v2172_v53  ;;  %v892_v63 = vmul.f32 %v876_v3, %v2021_v32 }
 0x137   : > { %v757_v9 = vmul.f32 %v2365_v25, %v2124_v43  ;;  %v865_v54 = vsel %vm833_vm8, %v817_v29, %v849_v48  ;;  %v688_v47 = vmul.f32 %v2109_v38, %v672_v2  ;;  %v611_v49 = vadd.f32 -1.4531521, %v595_v44 }
 0x138   : > { %v2366_v23 = vsub.f32 0.0, %v2129_v52  ;;  %v863_v43 = vsel %vm831_vm9, %v815_v18, %v847_v10  ;;  %v690_v1 = vmul.f32 %v2146_v50, %v674_v35  ;;  %v613_v0 = vadd.f32 -1.4531521, %v597_v31 }
 0x139   : > { %v906_v40 = vpack.c.bf16 %v894_v13, %v892_v63  ;;  %v704_v6 = vadd.f32 0.2548296, %v688_v47  ;;  %v627_v32 = vmul.f32 %v2161_v55, %v611_v49  ;;  %v596_v28 = vmul.f32 1.0614054, %v2167_v4  ;;  %v2367_v49 = vld [vmem:[#allocation16_spill] sm:$0xff] }
 0x13a   : > { %v758_v8 = vmul.f32 %v2366_v23, %v2129_v52  ;;  %v881_v14 = vadd.f32 1.0, %v865_v54  ;;  %v706_v30 = vadd.f32 0.2548296, %v690_v1  ;;  %v629_v22 = vmul.f32 %v2172_v53, %v613_v0  ;;  %v1568_v20 = vpop.eup %1567 }
 0x13b   : > { %v598_v52 = vmul.f32 1.0614054, %v2175_v33  ;;  %v787_v34 = vmul.f32 1.442695, %v757_v9  ;;  %v720_v7 = vmul.f32 %v2109_v38, %v704_v6  ;;  %v643_v16 = vadd.f32 1.4214138, %v627_v32 }
 0x13c   : > { %v612_v41 = vadd.f32 -1.4531521, %v596_v28  ;;  %v879_v46 = vadd.f32 1.0, %v863_v43  ;;  %v722_v61 = vmul.f32 %v2146_v50, %v706_v30  ;;  %v645_v60 = vadd.f32 1.4214138, %v629_v22 }
 0x13d   : > { %v614_v27 = vadd.f32 -1.4531521, %v598_v52  ;;  %v789_v37 = vmul.f32 1.442695, %v758_v8  ;;  %1085 = vmatmul.bf16.gmra.mxu3 %v906_v40  ;;  %v800_v42 = vmul.f32 %v2126_v51, %v720_v7  ;;  %v659_v59 = vmul.f32 %v2161_v55, %v643_v16  ;;  %v2370_v16 = vld [vmem:[#allocation23_spill] sm:$0xff] }
 0x13e   : > { %v628_v11 = vmul.f32 %v2167_v4, %v612_v41  ;;  %v897_v21 = vmul.f32 %v881_v14, %v2088_v24  ;;  %v802_v57 = vmul.f32 %v1568_v20, %v722_v61  ;;  %v661_v38 = vmul.f32 %v2172_v53, %v645_v60  ;;  %v2369_v20 = vld [vmem:[#allocation18_spill] sm:$0xff] }
 0x13f   : > { %v630_v5 = vmul.f32 %v2175_v33, %v614_v27  ;;  %1569 = vpow2.f32 %v2135_v15  ;;  %v816_v50 = vsub.f32 1.0, %v800_v42  ;;  %v675_v18 = vadd.f32 -0.28449672, %v659_v59  ;;  %v2372_v42 = vld [vmem:[#allocation21_spill] sm:$0xff] }
 0x140   : > { %v644_v17 = vadd.f32 1.4214138, %v628_v11  ;;  %v895_v56 = vmul.f32 %v879_v46, %v2058_v45  ;;  %v818_v3 = vsub.f32 1.0, %v802_v57  ;;  %v677_v51 = vadd.f32 -0.28449672, %v661_v38  ;;  %v2374_v38 = vld [vmem:[#allocation24_spill] sm:$0xff] }
 0x141   : > { %v646_v29 = vadd.f32 1.4214138, %v630_v5  ;;  %1571 = vpow2.f32 %v787_v34  ;;  %v848_v19 = vsub.f32 0.0, %v816_v50  ;;  %v691_v58 = vmul.f32 %v2161_v55, %v675_v18 }
 0x142   : > { %v660_v24 = vmul.f32 %v2167_v4, %v644_v17  ;;  %v907_v12 = vpack.c.bf16 %v897_v21, %v895_v56  ;;  %v850_v10 = vsub.f32 0.0, %v818_v3  ;;  %v693_v26 = vmul.f32 %v2172_v53, %v677_v51  ;;  %v2373_v21 = vld [vmem:[#allocation19_spill] sm:$0xff]  ;;  %v2375_v56 = vld [vmem:[#allocation22_spill] sm:$0xff] }
 0x143   : > { %v662_v15 = vmul.f32 %v2175_v33, %v646_v29  ;;  %1573 = vpow2.f32 %v2141_v62  ;;  %v864_v45 = vsel %vm832_vm10, %v816_v50, %v848_v19  ;;  %v707_v48 = vadd.f32 0.2548296, %v691_v58  ;;  %v2376_v58 = vld [vmem:[#allocation17_spill] sm:$0xff] }
 0x144   : > { %v676_v2 = vadd.f32 -0.28449672, %v660_v24  ;;  %v866_v44 = vsel %vm834_vm11, %v818_v3, %v850_v10  ;;  %v880_v25 = vadd.f32 1.0, %v864_v45  ;;  %v709_v9 = vadd.f32 0.2548296, %v693_v26 }
 0x145   : > { %v678_v13 = vadd.f32 -0.28449672, %v662_v15  ;;  %v1570_v35 = vpop.eup %1569  ;;  %1575 = vpow2.f32 %v789_v37  ;;  %v882_v31 = vadd.f32 1.0, %v866_v44  ;;  %v723_v63 = vmul.f32 %v2161_v55, %v707_v48  ;;  %v2371_v37 = vld [vmem:[#allocation15_spill] sm:$0xff]  ;;  %v1512_v45 = vld [vmem:[%s2337_s4] ss:$0 sm:$0xff] }
 0x146   : > { %v692_v54 = vmul.f32 %v2167_v4, %v676_v2  ;;  %1061 = vmatmul.bf16.gmra.mxu2 %v907_v12  ;;  %v725_v62 = vmul.f32 %v2172_v53, %v709_v9  ;;  %v896_v23 = vmul.f32 %v880_v25, %v2367_v49  ;;  %vm835_vm12 = vcmp.ge.f32.partialorder %v2369_v20, 0.0 }
 0x147   : > { %v694_v39 = vmul.f32 %v2175_v33, %v678_v13  ;;  %v1572_v47 = vpop.eup %1571  ;;  %v898_v8 = vmul.f32 %v882_v31, %v2368_v36  ;;  %v803_v43 = vmul.f32 %v1570_v35, %v723_v63  ;;  %vm837_vm13 = vcmp.ge.f32.partialorder %v2370_v16, 0.0 }
 0x148   : > { %v708_v1 = vadd.f32 0.2548296, %v692_v54  ;;  %v805_v0 = vmul.f32 %v1572_v47, %v725_v62  ;;  %v501_v59 = vmul.f32 0.5, %v2372_v42  ;;  %vm836_vm14 = vcmp.ge.f32.partialorder %v2373_v21, 0.0 }
 0x149   : > { %v710_v40 = vadd.f32 0.2548296, %v694_v39  ;;  %v1574_v6 = vpop.eup %1573  ;;  %v908_v32 = vpack.c.bf16 %v898_v8, %v896_v23  ;;  %v819_v28 = vsub.f32 1.0, %v803_v43  ;;  %vm838_vm15 = vcmp.ge.f32.partialorder %v2374_v38, 0.0 }
 0x14a   : > { %v724_v55 = vmul.f32 %v2167_v4, %v708_v1  ;;  %v821_v14 = vsub.f32 1.0, %v805_v0  ;;  %v499_v4 = vmul.f32 0.5, %v2371_v37  ;;  %v502_v3 = vmul.f32 0.5, %v2375_v56 }
 0x14b   : > { %v726_v30 = vmul.f32 %v2175_v33, %v710_v40  ;;  %v1576_v53 = vpop.eup %1575  ;;  %v851_v22 = vsub.f32 0.0, %v819_v28  ;;  %v500_v24 = vmul.f32 0.5, %v2376_v58 }
 0x14c   : > { %v804_v52 = vmul.f32 %v1574_v6, %v724_v55  ;;  %v853_v34 = vsub.f32 0.0, %v821_v14 }
 0x14d   : > { %v806_v7 = vmul.f32 %v1576_v53, %v726_v30  ;;  %1090 = vmatmul.bf16.gmra.mxu3 %v908_v32  ;;  %v867_v41 = vsel %vm835_vm12, %v819_v28, %v851_v22 }
 0x14e   : > { %v820_v46 = vsub.f32 1.0, %v804_v52  ;;  %v869_v61 = vsel %vm837_vm13, %v821_v14, %v853_v34  ;;  %v883_v60 = vadd.f32 1.0, %v867_v41 }
 0x14f   : > { %v822_v27 = vsub.f32 1.0, %v806_v7  ;;  %v885_v33 = vadd.f32 1.0, %v869_v61 }
 0x150   : > { %v852_v11 = vsub.f32 0.0, %v820_v46  ;;  %v899_v5 = vmul.f32 %v883_v60, %v499_v4 }
 0x151   : > { %v854_v57 = vsub.f32 0.0, %v822_v27  ;;  %v901_v50 = vmul.f32 %v885_v33, %v501_v59 }
 0x152   : > { %v868_v18 = vsel %vm836_vm14, %v820_v46, %v852_v11 }
 0x153   : > { %v870_v17 = vsel %vm838_vm15, %v822_v27, %v854_v57  ;;  %v909_v51 = vpack.c.bf16 %v901_v50, %v899_v5  ;;  %v884_v29 = vadd.f32 1.0, %v868_v18 }
 0x154   : > { %v886_v19 = vadd.f32 1.0, %v870_v17 }
 0x155   : > { %v900_v10 = vmul.f32 %v884_v29, %v500_v24 }
 0x156   : > { %v902_v12 = vmul.f32 %v886_v19, %v502_v3  ;;  %1066 = vmatmul.bf16.gmra.mxu2 %v909_v51 }
 0x158   : > { %v910_v26 = vpack.c.bf16 %v902_v12, %v900_v10 }
 0x15d   : > { %1095 = vmatmul.bf16.gmra.mxu3 %v910_v26 }
 0x19b   : > { %v1052_v15 = vpop.f32.mrf.mxu2 }
 0x19c   : > { %v1053_v48 = vadd.f32 %v1512_v45, %v1052_v15 }
 0x1a3   : > { %v1054_v2 = vpop.f32.mrf.mxu2 }
 0x1a4   : > { %v1055_v9 = vadd.f32 %v1512_v45, %v1054_v2 }
 0x1b0   : > { %v1081_v44 = vpop.f32.mrf.mxu3 }
 0x1b1   : > { %v1082_v25 = vadd.f32 %v1081_v44, %v1053_v48 }
 0x1b3   : > { %1101 = vst [vmem:[%s2290_s16] sm:$0xff] %v1082_v25 }
 0x1b8   : > { %v1083_v13 = vpop.f32.mrf.mxu3 }
 0x1b9   : > { %v1084_v35 = vadd.f32 %v1083_v13, %v1055_v9  ;;  %v1057_v31 = vpop.f32.mrf.mxu2 }
 0x1ba   : > { %v1058_v63 = vadd.f32 %v1512_v45, %v1057_v31 }
 0x1bb   : > { %1102 = vst [vmem:[%s2290_s16 + $0x8] sm:$0xff] %v1084_v35 }
 0x1c0   : > { %v1086_v54 = vpop.f32.mrf.mxu3 }
 0x1c1   : > { %v1087_v62 = vadd.f32 %v1086_v54, %v1058_v63  ;;  %v1059_v39 = vpop.f32.mrf.mxu2 }
 0x1c2   : > { %v1060_v47 = vadd.f32 %v1512_v45, %v1059_v39 }
 0x1c3   : > { %1103 = vst [vmem:[%s2290_s16 + $0x10] sm:$0xff] %v1087_v62 }
 0x1c8   : > { %v1088_v49 = vpop.f32.mrf.mxu3 }
 0x1c9   : > { %v1089_v23 = vadd.f32 %v1088_v49, %v1060_v47  ;;  %v1062_v36 = vpop.f32.mrf.mxu2 }
 0x1ca   : > { %v1063_v8 = vadd.f32 %v1512_v45, %v1062_v36 }
 0x1cb   : > { %1104 = vst [vmem:[%s2290_s16 + $0x18] sm:$0xff] %v1089_v23 }
 0x1d0   : > { %v1091_v43 = vpop.f32.mrf.mxu3 }
 0x1d1   : > { %v1092_v1 = vadd.f32 %v1091_v43, %v1063_v8  ;;  %v1064_v0 = vpop.f32.mrf.mxu2 }
 0x1d2   : > { %v1065_v40 = vadd.f32 %v1512_v45, %v1064_v0 }
 0x1d3   : > { %1105 = vst [vmem:[%s2290_s16 + $0x20] sm:$0xff] %v1092_v1 }
 0x1d8   : > { %v1093_v6 = vpop.f32.mrf.mxu3 }
 0x1d9   : > { %v1094_v32 = vadd.f32 %v1093_v6, %v1065_v40  ;;  %v1067_v28 = vpop.f32.mrf.mxu2 }
 0x1da   : > { %v1068_v55 = vadd.f32 %v1512_v45, %v1067_v28 }
 0x1db   : > { %1106 = vst [vmem:[%s2290_s16 + $0x28] sm:$0xff] %v1094_v32 }
 0x1e0   : > { %v1096_v14 = vpop.f32.mrf.mxu3 }
 0x1e1   : > { %v1097_v30 = vadd.f32 %v1096_v14, %v1068_v55  ;;  %v1069_v53 = vpop.f32.mrf.mxu2 }
 0x1e2   : > { %v1070_v22 = vadd.f32 %v1512_v45, %v1069_v53 }
 0x1e3   : > { %1107 = vst [vmem:[%s2290_s16 + $0x30] sm:$0xff] %v1097_v30 }
 0x1e8   : > { %v1098_v52 = vpop.f32.mrf.mxu3 }
 0x1e9   : > { %v1099_v20 = vadd.f32 %v1098_v52, %v1070_v22 }
 0x1eb   : > { %1108 = vst [vmem:[%s2290_s16 + $0x38] sm:$0xff] %v1099_v20 }
 0x1ec   : > { %1724 = shalt.err (!%p1721_p10)
}
 0x1ed   : > { %s1780_s17 = smov 128   ;;  %s1781_s28 = smov 8  }
 0x1ee   : > { %1443 = dma.vmem_to_hbm [thread:$0]  (%p1896_p0), %s1123_s12, 1024, %s1125_s14, %s1110_s15, %s1780_s17, %s1780_s17, %s1781_s28  }
 0x1ef PF: > { %p1470_p11 = scmp.ge.s32.totalorder %s1771_s21, 2  ;;  %s1139_s16 = sand.u32 1, %s1759_s18  }
 0x1f0   : > { %s1140_s23 = scalar_lea.sflag [#allocation4], %s1139_s16 }
 0x1f1   : > { %p1460_p12 = pnand %p1470_p11, %p1847_p6 }
 0x1f3   : > { %p1461_p13 = pneg %p1460_p12 }
 0x1f5   : > { %1754 = dma.done.wait (%p1461_p13), %s1140_s23, 1024  }
 0x1f6   : > { %1756 = vsyncadd (%p1461_p13), %s1140_s23, 4294966272  ;;  %p20_p3 = scmp.ge.s32.totalorder %s1883_s30, 6   ;;  %s2377_s18 = smov %s1763_s19 }
 0x1f7   : > { %s2378_s19 = smov %s1767_s20  ;;  %s2379_s20 = smov %s1892_s9 }
 0x1f8   : > { %s2380_s21 = smov %s1883_s30  ;;  %22 = sbr.rel (!%p20_p3) target bundleno = 7 (0x7), region = 97 }
 0x1fd   :  { %1146 = vsyncpa [#allocation3], 1 }
 0x1fe   :  { %1148 = vsyncpa [#allocation3 + $0x1], 1 }
 0x1ff   :  { %1149 = vsyncpa [#allocation6], 1 }
 0x200   :  { %1150 = vsyncpa [#allocation9], 1 }
 0x201   :  { %1151 = vsyncpa [#allocation4], 1 }
 0x202   :  { %1153 = vsyncpa [#allocation4 + $0x1], 1 }

</bundles_post_ra>
